<compile_context>
chip_gen: v7x
topology: tpu7x:2x2x1
jax: 0.10.0
libtpu: 0.0.40
codegen_flags: <defaults>
</compile_context>

<pallas_src>
import jax
import jax.numpy as jnp
from jax.experimental import pallas as pl
from jax.experimental.pallas import tpu as pltpu

NC = 2                     # feature dim of `value`
VROWS = 8                  # f32 sublane tile: rows 0:NC = value, row NC = 1.0, rest = 0
N_HIDDEN = 128
N_TRANSFORMERS = 4
LANE = 128
MAX_BLOCK_B = 8192         # VMEM-safe cap for v7x (64 MiB physical / 32 MiB scoped)


def _round_up(x, m):
    return ((x + m - 1) // m) * m


def transformer_model_kernel(x_ref, w1_ref, w2_ref, b2_ref, w3_ref, b3_ref, out_ref):
    """Fused forward of all coupling blocks on one lane-dense (VROWS, TB) batch tile.

    x_ref  : (VROWS, TB)          f32   rows 0:NC value, row NC ones, rest zeros
    w1_ref : (T, H, VROWS)        bf16  layer-1 weight, b1 folded into column NC (MXU)
    w2_ref : (T, H, H)            bf16  layer-2 weight [out, in]                 (MXU)
    b2_ref : (T, H, 1)            f32
    w3_ref : (T, 2*VROWS, H)      bf16  merged heads: rows 0:NC translation,
                                        rows VROWS:VROWS+NC log_scale, rest zero (MXU)
    b3_ref : (T, 2*VROWS, 1)      f32   matching layout, unused rows zero
    out_ref: (VROWS, TB)          f32
    """
    v = x_ref[...]                                            # (VROWS, TB) f32 state
    n_t = w1_ref.shape[0]
    for t in range(n_t):                                      # static unroll over 4 blocks
        # ---- layer 1 on the MXU: tiny-K contraction, bias folded via the ones row
        h = jnp.dot(w1_ref[t], v.astype(w1_ref.dtype),
                    preferred_element_type=jnp.float32)       # (H, TB)

        # ---- layer 2: dominant (H,H)@(H,TB) matmul; relu + bf16 cast fused in operand
        h2 = jnp.dot(w2_ref[t], jnp.maximum(h, 0.0).astype(w2_ref.dtype),
                     preferred_element_type=jnp.float32) + b2_ref[t]

        # ---- merged translation / log_scale head (one weight push + result pop)
        pars = jnp.dot(w3_ref[t], jnp.maximum(h2, 0.0).astype(w3_ref.dtype),
                       preferred_element_type=jnp.float32) + b3_ref[t]   # (16, TB)
        translation = pars[0:VROWS, :]                        # tile-aligned sublane slice
        log_scale = pars[VROWS:2 * VROWS, :]

        # ---- affine coupling (f32 VPU/EUP); ones row: exp(0)*1+0 = 1, zero rows stay 0
        v = jnp.exp(log_scale) * v + translation
    out_ref[...] = v.astype(out_ref.dtype)


def transformer_model_forward(value, kparams, *, block_b=2048):
    """value: (B, NC) f32. kparams: output of prepare_kernel_params."""
    B, nc = value.shape
    assert nc == NC

    block_b = min(MAX_BLOCK_B, max(LANE, _round_up(block_b, LANE)))
    tb = min(block_b, _round_up(B, LANE))                     # lane-aligned batch tile
    b_pad = _round_up(B, tb)
    grid = (b_pad // tb,)

    # lane-dense transposed + padded layout: rows 0:NC value, row NC ones (bias fold)
    v_t = jnp.zeros((VROWS, b_pad), jnp.float32)
    v_t = v_t.at[:NC, :B].set(value.T)
    v_t = v_t.at[NC, :].set(1.0)

    w1, w2, b2, w3, b3 = (kparams["w1a"], kparams["w2T"], kparams["b2"],
                          kparams["w3m"], kparams["b3m"])

    def resident(a):
        # full-array block, constant block index -> weights DMA'd once, stay VMEM-resident
        return pl.BlockSpec(a.shape, lambda i, _nd=a.ndim: (0,) * _nd)

    out_t = pl.pallas_call(
        transformer_model_kernel,
        out_shape=jax.ShapeDtypeStruct((VROWS, b_pad), jnp.float32),
        grid=grid,
        in_specs=[
            pl.BlockSpec((VROWS, tb), lambda i: (0, i)),      # value tile (batch on lanes)
            resident(w1), resident(w2), resident(b2),
            resident(w3), resident(b3),
        ],
        out_specs=pl.BlockSpec((VROWS, tb), lambda i: (0, i)),
        compiler_params=pltpu.CompilerParams(
            dimension_semantics=("parallel",)),                # shards tiles across TCs
    )(v_t, w1, w2, b2, w3, b3)

    return out_t[:NC, :B].T                                   # back to (B, NC)


def init_params(key, n_transformers=N_TRANSFORMERS):
    """Deterministic synthetic parameters, PyTorch layout: W is [in, out]."""
    ks = jax.random.split(key, 6 * n_transformers)

    def stack(fn):
        return jnp.stack([fn(t) for t in range(n_transformers)])

    w1 = stack(lambda t: 0.10 * jax.random.normal(ks[6 * t + 0], (NC, N_HIDDEN), jnp.float32))
    b1 = stack(lambda t: 0.10 * jax.random.normal(ks[6 * t + 1], (N_HIDDEN,), jnp.float32))
    w2 = stack(lambda t: 0.05 * jax.random.normal(ks[6 * t + 2], (N_HIDDEN, N_HIDDEN), jnp.float32))
    b2 = stack(lambda t: 0.05 * jax.random.normal(ks[6 * t + 3], (N_HIDDEN,), jnp.float32))
    w3 = stack(lambda t: 0.05 * jax.random.normal(ks[6 * t + 4], (N_HIDDEN, 2 * NC), jnp.float32))
    b3 = stack(lambda t: 0.05 * jax.random.normal(ks[6 * t + 5], (2 * NC,), jnp.float32))
    return {"w1": w1, "b1": b1, "w2": w2, "b2": b2, "w3": w3, "b3": b3}


def prepare_kernel_params(params, matmul_dtype=jnp.bfloat16):
    """Kernel layout: [out,in] weights, b1 folded into layer-1, merged padded heads, bf16."""
    n_t = params["w1"].shape[0]

    # layer 1: (T, H, VROWS) with columns 0:NC = W1^T, column NC = b1, rest zero
    w1T = jnp.transpose(params["w1"], (0, 2, 1))                        # (T, H, NC)
    w1a = jnp.zeros((n_t, N_HIDDEN, VROWS), jnp.float32)
    w1a = w1a.at[:, :, :NC].set(w1T)
    w1a = w1a.at[:, :, NC].set(params["b1"])
    w1a = w1a.astype(matmul_dtype)

    w2T = jnp.transpose(params["w2"], (0, 2, 1)).astype(matmul_dtype)   # (T, H, H)
    b2 = params["b2"][:, :, None]                                       # (T, H, 1)

    # merged heads, sublane-tile-aligned: rows 0:NC translation, rows VROWS:VROWS+NC log_scale
    w3T = jnp.transpose(params["w3"], (0, 2, 1))                        # (T, 2NC, H)
    w3m = jnp.zeros((n_t, 2 * VROWS, N_HIDDEN), jnp.float32)
    w3m = w3m.at[:, 0:NC, :].set(w3T[:, :NC, :])
    w3m = w3m.at[:, VROWS:VROWS + NC, :].set(w3T[:, NC:, :])
    w3m = w3m.astype(matmul_dtype)

    b3m = jnp.zeros((n_t, 2 * VROWS, 1), jnp.float32)
    b3m = b3m.at[:, 0:NC, 0].set(params["b3"][:, :NC])
    b3m = b3m.at[:, VROWS:VROWS + NC, 0].set(params["b3"][:, NC:])

    return {"w1a": w1a, "w2T": w2T, "b2": b2, "w3m": w3m, "b3m": b3m}


def reference_forward_f32(value, params):
    """Pure-f32 JAX reference matching the PyTorch module exactly."""
    v = value
    for t in range(params["w1"].shape[0]):
        h = jnp.maximum(v @ params["w1"][t] + params["b1"][t], 0.0)
        h = jnp.maximum(h @ params["w2"][t] + params["b2"][t], 0.0)
        pars = h @ params["w3"][t] + params["b3"][t]
        translation, log_scale = pars[:, :NC], pars[:, NC:]
        v = jnp.exp(log_scale) * v + translation
    return v


def reference_forward_matched(value, kparams):
    """Mirror of the kernel math (same padded layout and bf16 matmul inputs)."""
    B = value.shape[0]
    v = jnp.zeros((VROWS, B), jnp.float32).at[:NC, :].set(value.T).at[NC, :].set(1.0)
    for t in range(kparams["w1a"].shape[0]):
        h = jnp.dot(kparams["w1a"][t], v.astype(kparams["w1a"].dtype),
                    preferred_element_type=jnp.float32)
        h2 = jnp.dot(kparams["w2T"][t],
                     jnp.maximum(h, 0.0).astype(kparams["w2T"].dtype),
                     preferred_element_type=jnp.float32) + kparams["b2"][t]
        pars = jnp.dot(kparams["w3m"][t],
                       jnp.maximum(h2, 0.0).astype(kparams["w3m"].dtype),
                       preferred_element_type=jnp.float32) + kparams["b3m"][t]
        v = jnp.exp(pars[VROWS:2 * VROWS, :]) * v + pars[0:VROWS, :]
    return v[:NC, :].T


if __name__ == "__main__":
    key = jax.random.PRNGKey(0)
    pkey, xkey = jax.random.split(key)
    params = init_params(pkey)                 # PyTorch-layout f32 weights
    kparams = prepare_kernel_params(params)    # kernel layout (folded/merged/bf16)

    B = 300                                    # non-multiple of the tile -> exercises padding
    value = jax.random.normal(xkey, (B, NC), jnp.float32)

    # block_b=256 keeps the demo small while still giving grid=(2,) (megacore-friendly);
    # production callers should use the default block_b=2048 (capped at 8192 for v7x VMEM).
    out = transformer_model_forward(value, kparams, block_b=256)
    out = jax.block_until_ready(out)
    assert out.shape == (B, NC)

    # Strict check against a dtype-matched reference of the kernel math.
    ref_matched = reference_forward_matched(value, kparams)
    err_m = float(jnp.max(jnp.abs(out - ref_matched)))
    assert jnp.allclose(out, ref_matched, atol=2e-4, rtol=2e-4), err_m

    # Semantic check against the exact f32 PyTorch forward (loose: bf16 matmul inputs).
    ref_f32 = reference_forward_f32(value, params)
    err_f = float(jnp.max(jnp.abs(out - ref_f32)))
    assert jnp.allclose(out, ref_f32, atol=5e-2, rtol=5e-2), err_f

    # TODO(synk): inverse pass (is_forward=False) and the per-block `conditions`
    # bookkeeping (module side-effect attributes) are not produced by this kernel.

    print("KERNEL_OK")
</pallas_src>

<mosaic_0001>
module attributes {stable_mosaic.version = 11 : i64} {
  func.func @transformer_model_kernel(%arg0: i32, %arg1: memref<8x256xf32, #tpu.memory_space<vmem>>, %arg2: memref<4x128x8xbf16, #tpu.memory_space<vmem>>, %arg3: memref<4x128x128xbf16, #tpu.memory_space<vmem>>, %arg4: memref<4x128x1xf32, #tpu.memory_space<vmem>>, %arg5: memref<4x16x128xbf16, #tpu.memory_space<vmem>>, %arg6: memref<4x16x1xf32, #tpu.memory_space<vmem>>, %arg7: memref<8x256xf32, #tpu.memory_space<vmem>>) attributes {dimension_semantics = [#tpu.dimension_semantics<parallel>], iteration_bounds = array<i64: 2>, scalar_prefetch = 0 : i64, scratch_operands = 0 : i64, tpu.core_type = #tpu.core_type<tc>, window_params = [{transform_indices = @transform_0, window_bounds = array<i64: 8, 256>}, {pipeline_mode = #tpu.pipeline_mode<synchronous>, transform_indices = @transform_1, window_bounds = array<i64: 4, 128, 8>}, {pipeline_mode = #tpu.pipeline_mode<synchronous>, transform_indices = @transform_2, window_bounds = array<i64: 4, 128, 128>}, {pipeline_mode = #tpu.pipeline_mode<synchronous>, transform_indices = @transform_3, window_bounds = array<i64: 4, 128, 1>}, {pipeline_mode = #tpu.pipeline_mode<synchronous>, transform_indices = @transform_4, window_bounds = array<i64: 4, 16, 128>}, {pipeline_mode = #tpu.pipeline_mode<synchronous>, transform_indices = @transform_5, window_bounds = array<i64: 4, 16, 1>}, {transform_indices = @transform_6, window_bounds = array<i64: 8, 256>}]} {
    %c0 = arith.constant 0 : index
    %c0_0 = arith.constant 0 : index
    %0 = vector.load %arg1[%c0, %c0_0] : memref<8x256xf32, #tpu.memory_space<vmem>>, vector<8x256xf32>
    %c0_1 = arith.constant 0 : index
    %c0_2 = arith.constant 0 : index
    %c0_3 = arith.constant 0 : index
    %1 = vector.load %arg2[%c0_1, %c0_2, %c0_3] : memref<4x128x8xbf16, #tpu.memory_space<vmem>>, vector<1x128x8xbf16>
    %2 = vector.shape_cast %1 : vector<1x128x8xbf16> to vector<128x8xbf16>
    %3 = arith.truncf %0 : vector<8x256xf32> to vector<8x256xbf16>
    %cst = arith.constant dense<0.000000e+00> : vector<128x256xf32>
    %4 = tpu.matmul %2, %3, %cst {dimension_numbers = #tpu.dot_dimension_numbers<[1], [0], [0], [1], [0, 0, 1, 1], [], []>} : vector<128x8xbf16>, vector<8x256xbf16>, vector<128x256xf32> -> vector<128x256xf32>
    %c0_4 = arith.constant 0 : index
    %c0_5 = arith.constant 0 : index
    %c0_6 = arith.constant 0 : index
    %5 = vector.load %arg3[%c0_4, %c0_5, %c0_6] : memref<4x128x128xbf16, #tpu.memory_space<vmem>>, vector<1x128x128xbf16>
    %6 = vector.shape_cast %5 : vector<1x128x128xbf16> to vector<128x128xbf16>
    %cst_7 = arith.constant 0.000000e+00 : f32
    %7 = vector.broadcast %cst_7 : f32 to vector<128x256xf32>
    %8 = arith.maximumf %4, %7 : vector<128x256xf32>
    %9 = arith.truncf %8 : vector<128x256xf32> to vector<128x256xbf16>
    %cst_8 = arith.constant dense<0.000000e+00> : vector<128x256xf32>
    %10 = tpu.matmul %6, %9, %cst_8 {dimension_numbers = #tpu.dot_dimension_numbers<[1], [0], [0], [1], [0, 0, 1, 1], [], []>} : vector<128x128xbf16>, vector<128x256xbf16>, vector<128x256xf32> -> vector<128x256xf32>
    %c0_9 = arith.constant 0 : index
    %c0_10 = arith.constant 0 : index
    %c0_11 = arith.constant 0 : index
    %11 = vector.load %arg4[%c0_9, %c0_10, %c0_11] : memref<4x128x1xf32, #tpu.memory_space<vmem>>, vector<1x128x1xf32>
    %12 = vector.shape_cast %11 : vector<1x128x1xf32> to vector<128x1xf32>
    %13 = vector.broadcast %12 : vector<128x1xf32> to vector<128x256xf32>
    %14 = arith.addf %10, %13 : vector<128x256xf32>
    %c0_12 = arith.constant 0 : index
    %c0_13 = arith.constant 0 : index
    %c0_14 = arith.constant 0 : index
    %15 = vector.load %arg5[%c0_12, %c0_13, %c0_14] : memref<4x16x128xbf16, #tpu.memory_space<vmem>>, vector<1x16x128xbf16>
    %16 = vector.shape_cast %15 : vector<1x16x128xbf16> to vector<16x128xbf16>
    %cst_15 = arith.constant 0.000000e+00 : f32
    %17 = vector.broadcast %cst_15 : f32 to vector<128x256xf32>
    %18 = arith.maximumf %14, %17 : vector<128x256xf32>
    %19 = arith.truncf %18 : vector<128x256xf32> to vector<128x256xbf16>
    %cst_16 = arith.constant dense<0.000000e+00> : vector<16x256xf32>
    %20 = tpu.matmul %16, %19, %cst_16 {dimension_numbers = #tpu.dot_dimension_numbers<[1], [0], [0], [1], [0, 0, 1, 1], [], []>} : vector<16x128xbf16>, vector<128x256xbf16>, vector<16x256xf32> -> vector<16x256xf32>
    %c0_17 = arith.constant 0 : index
    %c0_18 = arith.constant 0 : index
    %c0_19 = arith.constant 0 : index
    %21 = vector.load %arg6[%c0_17, %c0_18, %c0_19] : memref<4x16x1xf32, #tpu.memory_space<vmem>>, vector<1x16x1xf32>
    %22 = vector.shape_cast %21 : vector<1x16x1xf32> to vector<16x1xf32>
    %23 = vector.broadcast %22 : vector<16x1xf32> to vector<16x256xf32>
    %24 = arith.addf %20, %23 : vector<16x256xf32>
    %25 = vector.extract_strided_slice %24 {offsets = [0, 0], sizes = [8, 256], strides = [1, 1]} : vector<16x256xf32> to vector<8x256xf32>
    %26 = vector.extract_strided_slice %24 {offsets = [8, 0], sizes = [8, 256], strides = [1, 1]} : vector<16x256xf32> to vector<8x256xf32>
    %27 = math.exp %26 : vector<8x256xf32>
    %28 = arith.mulf %27, %0 : vector<8x256xf32>
    %29 = arith.addf %28, %25 : vector<8x256xf32>
    %c1 = arith.constant 1 : index
    %c0_20 = arith.constant 0 : index
    %c0_21 = arith.constant 0 : index
    %30 = vector.load %arg2[%c1, %c0_20, %c0_21] : memref<4x128x8xbf16, #tpu.memory_space<vmem>>, vector<1x128x8xbf16>
    %31 = vector.shape_cast %30 : vector<1x128x8xbf16> to vector<128x8xbf16>
    %32 = arith.truncf %29 : vector<8x256xf32> to vector<8x256xbf16>
    %cst_22 = arith.constant dense<0.000000e+00> : vector<128x256xf32>
    %33 = tpu.matmul %31, %32, %cst_22 {dimension_numbers = #tpu.dot_dimension_numbers<[1], [0], [0], [1], [0, 0, 1, 1], [], []>} : vector<128x8xbf16>, vector<8x256xbf16>, vector<128x256xf32> -> vector<128x256xf32>
    %c1_23 = arith.constant 1 : index
    %c0_24 = arith.constant 0 : index
    %c0_25 = arith.constant 0 : index
    %34 = vector.load %arg3[%c1_23, %c0_24, %c0_25] : memref<4x128x128xbf16, #tpu.memory_space<vmem>>, vector<1x128x128xbf16>
    %35 = vector.shape_cast %34 : vector<1x128x128xbf16> to vector<128x128xbf16>
    %cst_26 = arith.constant 0.000000e+00 : f32
    %36 = vector.broadcast %cst_26 : f32 to vector<128x256xf32>
    %37 = arith.maximumf %33, %36 : vector<128x256xf32>
    %38 = arith.truncf %37 : vector<128x256xf32> to vector<128x256xbf16>
    %cst_27 = arith.constant dense<0.000000e+00> : vector<128x256xf32>
    %39 = tpu.matmul %35, %38, %cst_27 {dimension_numbers = #tpu.dot_dimension_numbers<[1], [0], [0], [1], [0, 0, 1, 1], [], []>} : vector<128x128xbf16>, vector<128x256xbf16>, vector<128x256xf32> -> vector<128x256xf32>
    %c1_28 = arith.constant 1 : index
    %c0_29 = arith.constant 0 : index
    %c0_30 = arith.constant 0 : index
    %40 = vector.load %arg4[%c1_28, %c0_29, %c0_30] : memref<4x128x1xf32, #tpu.memory_space<vmem>>, vector<1x128x1xf32>
    %41 = vector.shape_cast %40 : vector<1x128x1xf32> to vector<128x1xf32>
    %42 = vector.broadcast %41 : vector<128x1xf32> to vector<128x256xf32>
    %43 = arith.addf %39, %42 : vector<128x256xf32>
    %c1_31 = arith.constant 1 : index
    %c0_32 = arith.constant 0 : index
    %c0_33 = arith.constant 0 : index
    %44 = vector.load %arg5[%c1_31, %c0_32, %c0_33] : memref<4x16x128xbf16, #tpu.memory_space<vmem>>, vector<1x16x128xbf16>
    %45 = vector.shape_cast %44 : vector<1x16x128xbf16> to vector<16x128xbf16>
    %cst_34 = arith.constant 0.000000e+00 : f32
    %46 = vector.broadcast %cst_34 : f32 to vector<128x256xf32>
    %47 = arith.maximumf %43, %46 : vector<128x256xf32>
    %48 = arith.truncf %47 : vector<128x256xf32> to vector<128x256xbf16>
    %cst_35 = arith.constant dense<0.000000e+00> : vector<16x256xf32>
    %49 = tpu.matmul %45, %48, %cst_35 {dimension_numbers = #tpu.dot_dimension_numbers<[1], [0], [0], [1], [0, 0, 1, 1], [], []>} : vector<16x128xbf16>, vector<128x256xbf16>, vector<16x256xf32> -> vector<16x256xf32>
    %c1_36 = arith.constant 1 : index
    %c0_37 = arith.constant 0 : index
    %c0_38 = arith.constant 0 : index
    %50 = vector.load %arg6[%c1_36, %c0_37, %c0_38] : memref<4x16x1xf32, #tpu.memory_space<vmem>>, vector<1x16x1xf32>
    %51 = vector.shape_cast %50 : vector<1x16x1xf32> to vector<16x1xf32>
    %52 = vector.broadcast %51 : vector<16x1xf32> to vector<16x256xf32>
    %53 = arith.addf %49, %52 : vector<16x256xf32>
    %54 = vector.extract_strided_slice %53 {offsets = [0, 0], sizes = [8, 256], strides = [1, 1]} : vector<16x256xf32> to vector<8x256xf32>
    %55 = vector.extract_strided_slice %53 {offsets = [8, 0], sizes = [8, 256], strides = [1, 1]} : vector<16x256xf32> to vector<8x256xf32>
    %56 = math.exp %55 : vector<8x256xf32>
    %57 = arith.mulf %56, %29 : vector<8x256xf32>
    %58 = arith.addf %57, %54 : vector<8x256xf32>
    %c2 = arith.constant 2 : index
    %c0_39 = arith.constant 0 : index
    %c0_40 = arith.constant 0 : index
    %59 = vector.load %arg2[%c2, %c0_39, %c0_40] : memref<4x128x8xbf16, #tpu.memory_space<vmem>>, vector<1x128x8xbf16>
    %60 = vector.shape_cast %59 : vector<1x128x8xbf16> to vector<128x8xbf16>
    %61 = arith.truncf %58 : vector<8x256xf32> to vector<8x256xbf16>
    %cst_41 = arith.constant dense<0.000000e+00> : vector<128x256xf32>
    %62 = tpu.matmul %60, %61, %cst_41 {dimension_numbers = #tpu.dot_dimension_numbers<[1], [0], [0], [1], [0, 0, 1, 1], [], []>} : vector<128x8xbf16>, vector<8x256xbf16>, vector<128x256xf32> -> vector<128x256xf32>
    %c2_42 = arith.constant 2 : index
    %c0_43 = arith.constant 0 : index
    %c0_44 = arith.constant 0 : index
    %63 = vector.load %arg3[%c2_42, %c0_43, %c0_44] : memref<4x128x128xbf16, #tpu.memory_space<vmem>>, vector<1x128x128xbf16>
    %64 = vector.shape_cast %63 : vector<1x128x128xbf16> to vector<128x128xbf16>
    %cst_45 = arith.constant 0.000000e+00 : f32
    %65 = vector.broadcast %cst_45 : f32 to vector<128x256xf32>
    %66 = arith.maximumf %62, %65 : vector<128x256xf32>
    %67 = arith.truncf %66 : vector<128x256xf32> to vector<128x256xbf16>
    %cst_46 = arith.constant dense<0.000000e+00> : vector<128x256xf32>
    %68 = tpu.matmul %64, %67, %cst_46 {dimension_numbers = #tpu.dot_dimension_numbers<[1], [0], [0], [1], [0, 0, 1, 1], [], []>} : vector<128x128xbf16>, vector<128x256xbf16>, vector<128x256xf32> -> vector<128x256xf32>
    %c2_47 = arith.constant 2 : index
    %c0_48 = arith.constant 0 : index
    %c0_49 = arith.constant 0 : index
    %69 = vector.load %arg4[%c2_47, %c0_48, %c0_49] : memref<4x128x1xf32, #tpu.memory_space<vmem>>, vector<1x128x1xf32>
    %70 = vector.shape_cast %69 : vector<1x128x1xf32> to vector<128x1xf32>
    %71 = vector.broadcast %70 : vector<128x1xf32> to vector<128x256xf32>
    %72 = arith.addf %68, %71 : vector<128x256xf32>
    %c2_50 = arith.constant 2 : index
    %c0_51 = arith.constant 0 : index
    %c0_52 = arith.constant 0 : index
    %73 = vector.load %arg5[%c2_50, %c0_51, %c0_52] : memref<4x16x128xbf16, #tpu.memory_space<vmem>>, vector<1x16x128xbf16>
    %74 = vector.shape_cast %73 : vector<1x16x128xbf16> to vector<16x128xbf16>
    %cst_53 = arith.constant 0.000000e+00 : f32
    %75 = vector.broadcast %cst_53 : f32 to vector<128x256xf32>
    %76 = arith.maximumf %72, %75 : vector<128x256xf32>
    %77 = arith.truncf %76 : vector<128x256xf32> to vector<128x256xbf16>
    %cst_54 = arith.constant dense<0.000000e+00> : vector<16x256xf32>
    %78 = tpu.matmul %74, %77, %cst_54 {dimension_numbers = #tpu.dot_dimension_numbers<[1], [0], [0], [1], [0, 0, 1, 1], [], []>} : vector<16x128xbf16>, vector<128x256xbf16>, vector<16x256xf32> -> vector<16x256xf32>
    %c2_55 = arith.constant 2 : index
    %c0_56 = arith.constant 0 : index
    %c0_57 = arith.constant 0 : index
    %79 = vector.load %arg6[%c2_55, %c0_56, %c0_57] : memref<4x16x1xf32, #tpu.memory_space<vmem>>, vector<1x16x1xf32>
    %80 = vector.shape_cast %79 : vector<1x16x1xf32> to vector<16x1xf32>
    %81 = vector.broadcast %80 : vector<16x1xf32> to vector<16x256xf32>
    %82 = arith.addf %78, %81 : vector<16x256xf32>
    %83 = vector.extract_strided_slice %82 {offsets = [0, 0], sizes = [8, 256], strides = [1, 1]} : vector<16x256xf32> to vector<8x256xf32>
    %84 = vector.extract_strided_slice %82 {offsets = [8, 0], sizes = [8, 256], strides = [1, 1]} : vector<16x256xf32> to vector<8x256xf32>
    %85 = math.exp %84 : vector<8x256xf32>
    %86 = arith.mulf %85, %58 : vector<8x256xf32>
    %87 = arith.addf %86, %83 : vector<8x256xf32>
    %c3 = arith.constant 3 : index
    %c0_58 = arith.constant 0 : index
    %c0_59 = arith.constant 0 : index
    %88 = vector.load %arg2[%c3, %c0_58, %c0_59] : memref<4x128x8xbf16, #tpu.memory_space<vmem>>, vector<1x128x8xbf16>
    %89 = vector.shape_cast %88 : vector<1x128x8xbf16> to vector<128x8xbf16>
    %90 = arith.truncf %87 : vector<8x256xf32> to vector<8x256xbf16>
    %cst_60 = arith.constant dense<0.000000e+00> : vector<128x256xf32>
    %91 = tpu.matmul %89, %90, %cst_60 {dimension_numbers = #tpu.dot_dimension_numbers<[1], [0], [0], [1], [0, 0, 1, 1], [], []>} : vector<128x8xbf16>, vector<8x256xbf16>, vector<128x256xf32> -> vector<128x256xf32>
    %c3_61 = arith.constant 3 : index
    %c0_62 = arith.constant 0 : index
    %c0_63 = arith.constant 0 : index
    %92 = vector.load %arg3[%c3_61, %c0_62, %c0_63] : memref<4x128x128xbf16, #tpu.memory_space<vmem>>, vector<1x128x128xbf16>
    %93 = vector.shape_cast %92 : vector<1x128x128xbf16> to vector<128x128xbf16>
    %cst_64 = arith.constant 0.000000e+00 : f32
    %94 = vector.broadcast %cst_64 : f32 to vector<128x256xf32>
    %95 = arith.maximumf %91, %94 : vector<128x256xf32>
    %96 = arith.truncf %95 : vector<128x256xf32> to vector<128x256xbf16>
    %cst_65 = arith.constant dense<0.000000e+00> : vector<128x256xf32>
    %97 = tpu.matmul %93, %96, %cst_65 {dimension_numbers = #tpu.dot_dimension_numbers<[1], [0], [0], [1], [0, 0, 1, 1], [], []>} : vector<128x128xbf16>, vector<128x256xbf16>, vector<128x256xf32> -> vector<128x256xf32>
    %c3_66 = arith.constant 3 : index
    %c0_67 = arith.constant 0 : index
    %c0_68 = arith.constant 0 : index
    %98 = vector.load %arg4[%c3_66, %c0_67, %c0_68] : memref<4x128x1xf32, #tpu.memory_space<vmem>>, vector<1x128x1xf32>
    %99 = vector.shape_cast %98 : vector<1x128x1xf32> to vector<128x1xf32>
    %100 = vector.broadcast %99 : vector<128x1xf32> to vector<128x256xf32>
    %101 = arith.addf %97, %100 : vector<128x256xf32>
    %c3_69 = arith.constant 3 : index
    %c0_70 = arith.constant 0 : index
    %c0_71 = arith.constant 0 : index
    %102 = vector.load %arg5[%c3_69, %c0_70, %c0_71] : memref<4x16x128xbf16, #tpu.memory_space<vmem>>, vector<1x16x128xbf16>
    %103 = vector.shape_cast %102 : vector<1x16x128xbf16> to vector<16x128xbf16>
    %cst_72 = arith.constant 0.000000e+00 : f32
    %104 = vector.broadcast %cst_72 : f32 to vector<128x256xf32>
    %105 = arith.maximumf %101, %104 : vector<128x256xf32>
    %106 = arith.truncf %105 : vector<128x256xf32> to vector<128x256xbf16>
    %cst_73 = arith.constant dense<0.000000e+00> : vector<16x256xf32>
    %107 = tpu.matmul %103, %106, %cst_73 {dimension_numbers = #tpu.dot_dimension_numbers<[1], [0], [0], [1], [0, 0, 1, 1], [], []>} : vector<16x128xbf16>, vector<128x256xbf16>, vector<16x256xf32> -> vector<16x256xf32>
    %c3_74 = arith.constant 3 : index
    %c0_75 = arith.constant 0 : index
    %c0_76 = arith.constant 0 : index
    %108 = vector.load %arg6[%c3_74, %c0_75, %c0_76] : memref<4x16x1xf32, #tpu.memory_space<vmem>>, vector<1x16x1xf32>
    %109 = vector.shape_cast %108 : vector<1x16x1xf32> to vector<16x1xf32>
    %110 = vector.broadcast %109 : vector<16x1xf32> to vector<16x256xf32>
    %111 = arith.addf %107, %110 : vector<16x256xf32>
    %112 = vector.extract_strided_slice %111 {offsets = [0, 0], sizes = [8, 256], strides = [1, 1]} : vector<16x256xf32> to vector<8x256xf32>
    %113 = vector.extract_strided_slice %111 {offsets = [8, 0], sizes = [8, 256], strides = [1, 1]} : vector<16x256xf32> to vector<8x256xf32>
    %114 = math.exp %113 : vector<8x256xf32>
    %115 = arith.mulf %114, %87 : vector<8x256xf32>
    %116 = arith.addf %115, %112 : vector<8x256xf32>
    %c0_77 = arith.constant 0 : index
    %c0_78 = arith.constant 0 : index
    %117 = vector.load %arg7[%c0_77, %c0_78] : memref<8x256xf32, #tpu.memory_space<vmem>>, vector<8x256xf32>
    tpu.vector_store %arg7[%c0_77, %c0_78], %116 {strides = array<i32>} : memref<8x256xf32, #tpu.memory_space<vmem>>, vector<8x256xf32>,
    return
  }
  func.func @transform_0(%arg0: i32) -> (i32, i32) {
    %c0_i32 = arith.constant 0 : i32
    %c0_i32_0 = arith.constant 0 : i32
    return %c0_i32, %arg0 : i32, i32
  }
  func.func @transform_1(%arg0: i32) -> (i32, i32, i32) {
    %c0_i32 = arith.constant 0 : i32
    %c0_i32_0 = arith.constant 0 : i32
    %c0_i32_1 = arith.constant 0 : i32
    %c0_i32_2 = arith.constant 0 : i32
    return %c0_i32, %c0_i32_0, %c0_i32_1 : i32, i32, i32
  }
  func.func @transform_2(%arg0: i32) -> (i32, i32, i32) {
    %c0_i32 = arith.constant 0 : i32
    %c0_i32_0 = arith.constant 0 : i32
    %c0_i32_1 = arith.constant 0 : i32
    %c0_i32_2 = arith.constant 0 : i32
    return %c0_i32, %c0_i32_0, %c0_i32_1 : i32, i32, i32
  }
  func.func @transform_3(%arg0: i32) -> (i32, i32, i32) {
    %c0_i32 = arith.constant 0 : i32
    %c0_i32_0 = arith.constant 0 : i32
    %c0_i32_1 = arith.constant 0 : i32
    %c0_i32_2 = arith.constant 0 : i32
    return %c0_i32, %c0_i32_0, %c0_i32_1 : i32, i32, i32
  }
  func.func @transform_4(%arg0: i32) -> (i32, i32, i32) {
    %c0_i32 = arith.constant 0 : i32
    %c0_i32_0 = arith.constant 0 : i32
    %c0_i32_1 = arith.constant 0 : i32
    %c0_i32_2 = arith.constant 0 : i32
    return %c0_i32, %c0_i32_0, %c0_i32_1 : i32, i32, i32
  }
  func.func @transform_5(%arg0: i32) -> (i32, i32, i32) {
    %c0_i32 = arith.constant 0 : i32
    %c0_i32_0 = arith.constant 0 : i32
    %c0_i32_1 = arith.constant 0 : i32
    %c0_i32_2 = arith.constant 0 : i32
    return %c0_i32, %c0_i32_0, %c0_i32_1 : i32, i32, i32
  }
  func.func @transform_6(%arg0: i32) -> (i32, i32) {
    %c0_i32 = arith.constant 0 : i32
    %c0_i32_0 = arith.constant 0 : i32
    return %c0_i32, %arg0 : i32, i32
  }
}

</mosaic_0001>

<bundles_post_ra>
// kernel: tpu_custom_call.1
= control target key start
LH: loop header
LB: loop body
LE: loop exit
PB: predicated region body
PF: predicated region fallthrough
CT: control target
= control target key end

     0   :  { %11 = vsyncpa [#allocation3], 0  ;;  %s4080_s0 = inlined_call_operand.vmem [shape: f32[8,512], index: 0, kind: input, shape index: {}]   ;;  %s4081_s1 = inlined_call_operand.vmem [shape: bf16[4,128,8], index: 1, kind: input, shape index: {}]   ;;  %s4082_s2 = inlined_call_operand.vmem [shape: bf16[4,128,128], index: 2, kind: input, shape index: {}]   ;;  %s4083_s3 = inlined_call_operand.vmem [shape: f32[4,128,1], index: 3, kind: input, shape index: {}]   ;;  %s4084_s4 = inlined_call_operand.vmem [shape: bf16[4,16,128], index: 4, kind: input, shape index: {}]   ;;  %s4085_s5 = inlined_call_operand.vmem [shape: f32[4,16,1], index: 5, kind: input, shape index: {}]   ;;  %s4086_s6 = inlined_call_operand.hbm [shape: f32[8,512], index: 6, kind: output, shape index: {}]  }
   0x1   :  { %13 = vsyncpa [#allocation3 + $0x1], 0  ;;  %s3415_s21 = smov 0   ;;  %s3417_s22 = smov 0  }
   0x2   :  { %s3419_s23 = smov 0   ;;  %s3421_s24 = smov 0  }
   0x3 LB: > { %s3436_s25 = sadd.s32 4294967295, %s3376_s24   ;;  %s2913_s26 = sadd.s32 4294967294, %s3376_s24   ;;  %s3376_s24 = sphi %s3421_s24, %s4092_s24   ;;  %s3372_s23 = sphi %s3419_s23, %s4091_s23   ;;  %s3368_s22 = sphi %s3417_s22, %s4090_s22   ;;  %s3364_s21 = sphi %s3415_s21, %s4089_s21  }
   0x4   : > { %s3440_s27 = sadd.s32 1, %s3376_s24   ;;  %s157_s28 = sadd.s32 1, %s3372_s23 }
   0x5   : > { %s154_s29 = ssub.s32 %s3376_s24, %s3440_s27  ;;  %p167_p0 = scmp.ne.s32.totalorder %s3372_s23, %s3368_s22 }
   0x6   : > { %p155_p1 = scmp.eq.s32.totalorder %s154_s29, 0  ;;  %p168_p2 = scmp.eq.s32.totalorder %s3436_s25, 1 }
   0x7   : > { %p173_p3 = scmp.ne.s32.totalorder %s3368_s22, %s3364_s21  ;;  %p174_p4 = scmp.eq.s32.totalorder %s2913_s26, 1 }
   0x8   : > { %s3451_s30 = scalar_select %p155_p1, %s3372_s23, %s157_s28  }
   0x9   : > { %p3453_p5 = por %p168_p2, %p167_p0  ;;  %p3457_p6 = por %p174_p4, %p173_p3 }
   0xa   : > { %p2916_p7 = scmp.ge.s32.totalorder %s3376_s24, 1  ;;  %p216_p8 = scmp.lt.s32.totalorder %s3376_s24, 3 }
   0xc   : > { %p217_p9 = pnand %p2916_p7, %p216_p8 }
   0xd   : > { %s2918_s9 = sshll.u32 (!%p217_p9), %s3436_s25, 1  ;;  %v3378_v0 = vmov (!%p217_p9), 0   ;;  %vm339_vm0 = vcmask (!%p217_p9), 1043456   ;;  %v3228_v5 = vld [vmem:[%s4081_s1] sm:$0xff] (!%p217_p9)   ;;  %vm314_vm1 = vcmask (!%p217_p9), 64512   ;;  %v3229_v7 = vld [vmem:[%s4081_s1 + $0x8] sm:$0xff] (!%p217_p9)  }
   0xe   : > { %220 = sbr.rel (%p217_p9) target bundleno = 3239 (0xca7), region = 44  ;;  %p247_p10 = scmp.lt.s32.totalorder (!%p217_p9), %s2918_s9, 3  ;;  %378 = vmatprep.mubr.bf16.mxu0 (!%p217_p9), %v3378_v0  ;;  %3226 = vset.pattern.permute.xlu0 (!%p217_p9), %v3378_v0  ;;  %v3230_v8 = vld [vmem:[%s4081_s1 + $0x10] sm:$0xff] (!%p217_p9)   ;;  %v3231_v9 = vld [vmem:[%s4081_s1 + $0x18] sm:$0xff] (!%p217_p9)   ;;  %v3232_v10 = vld [vmem:[%s4081_s1 + $0x20] sm:$0xff] (!%p217_p9)  }
   0xf   : > { %3227 = vset.pattern.permute.xlu1 (!%p217_p9), %v3378_v0  ;;  %699 = vmatprep.mubr.bf16.mxu1 (!%p217_p9), %v3378_v0  ;;  %v3233_v11 = vld [vmem:[%s4081_s1 + $0x28] sm:$0xff] (!%p217_p9)   ;;  %v3234_v12 = vld [vmem:[%s4081_s1 + $0x30] sm:$0xff] (!%p217_p9)   ;;  %v3235_v13 = vld [vmem:[%s4081_s1 + $0x38] sm:$0xff] (!%p217_p9)   ;;  %s243_s26 = sand.u32 (!%p217_p9), 1, %s3368_s22   ;;  %s3185_s29 = sshll.u32 (!%p217_p9), %s3436_s25, 8 }
  0x10   : > { %v523_v14 = vld [vmem:[%s4083_s3] sm:$0xff] (!%p217_p9)  ;;  %v524_v15 = vld [vmem:[%s4083_s3 + $0x8] sm:$0xff] (!%p217_p9)  ;;  %v525_v16 = vld [vmem:[%s4083_s3 + $0x10] sm:$0xff] (!%p217_p9)  ;;  %s2917_s28 = sshll.u32 (!%p217_p9), %s243_s26, 4  ;;  %s4038_s12 = scalar_lea.hbm (!%p217_p9), %s4086_s6, %s3185_s29 }
  0x11   : > { %541 = vperm.xlu0 (!%p217_p9), %3226, %v523_v14   ;;  %v527_v17 = vld [vmem:[%s4083_s3 + $0x20] sm:$0xff] (!%p217_p9)  ;;  %551 = vperm.xlu1 (!%p217_p9), %3227, %v525_v16   ;;  %v526_v18 = vld [vmem:[%s4083_s3 + $0x18] sm:$0xff] (!%p217_p9)  ;;  %v529_v19 = vld [vmem:[%s4083_s3 + $0x30] sm:$0xff] (!%p217_p9)  ;;  %s2840_s25 = scalar_lea.sflag (!%p217_p9), [#allocation3], %s243_s26  ;;  %s3379_s15 = smov (!%p217_p9), [#allocation2]  }
  0x12   : > { %v528_v20 = vld [vmem:[%s4083_s3 + $0x28] sm:$0xff] (!%p217_p9)  ;;  %v531_v21 = vld [vmem:[%s4083_s3 + $0x40] sm:$0xff] (!%p217_p9)  ;;  %v530_v22 = vld [vmem:[%s4083_s3 + $0x38] sm:$0xff] (!%p217_p9)  ;;  %s3318_s16 = sshll.u32 (!%p217_p9), %s3379_s15, 4  ;;  %s3319_s16 = int_to_ptr.vmem [resolvable:$false] %s3318_s16 }
  0x13   : > { %v533_v23 = vld [vmem:[%s4083_s3 + $0x50] sm:$0xff] (!%p217_p9)  ;;  %v532_v24 = vld [vmem:[%s4083_s3 + $0x48] sm:$0xff] (!%p217_p9)  ;;  %v535_v25 = vld [vmem:[%s4083_s3 + $0x60] sm:$0xff] (!%p217_p9)  ;;  %s3320_s17 = scalar_lea.vmem (!%p217_p9), %s3319_s16, 512 }
  0x14   : > { %v534_v26 = vld [vmem:[%s4083_s3 + $0x58] sm:$0xff] (!%p217_p9)  ;;  %v537_v27 = vld [vmem:[%s4083_s3 + $0x70] sm:$0xff] (!%p217_p9)  ;;  %v536_v28 = vld [vmem:[%s4083_s3 + $0x68] sm:$0xff] (!%p217_p9) }
  0x15   : > { %s4094_s9 = smov (!%p247_p10, %s2918_s9), 3  ;;  %546 = vperm.xlu0 %3226, %v524_v15   ;;  %556 = vperm.xlu1 %3227, %v526_v18   ;;  %v831_v29 = vld [vmem:[%s4085_s5 + $0x8] sm:$0xff]  ;;  %v538_v30 = vld [vmem:[%s4083_s3 + $0x78] sm:$0xff]  ;;  %v2995_v31 = vld [vmem:[%s4083_s3 + $0x80] sm:$0xff] }
  0x16   : > { %s2919_s10 = sshll.u32 %s4094_s9, 3  ;;  %v830_v32 = vld [vmem:[%s4085_s5] sm:$0xff]  ;;  %v2997_v33 = vld [vmem:[%s4083_s3 + $0x90] sm:$0xff]  ;;  %v2996_v34 = vld [vmem:[%s4083_s3 + $0x88] sm:$0xff]  ;;  %s245_s9 = scalar_lea.vmem [#allocation2], %s2917_s28 }
  0x17   : > { %s3471_s13 = scalar_lea.vmem %s4080_s0, %s2919_s10  ;;  %v2999_v35 = vld [vmem:[%s4083_s3 + $0xa0] sm:$0xff]  ;;  %v2998_v36 = vld [vmem:[%s4083_s3 + $0x98] sm:$0xff]  ;;  %v3001_v37 = vld [vmem:[%s4083_s3 + $0xb0] sm:$0xff]  ;;  %s2854_s10 = sshll.u32 %s245_s9, 4  ;;  %s4040_s10 = int_to_ptr.vmem [resolvable:$true] %s2854_s10 }
  0x18   : > { %v255_v1 = vld [vmem:[%s3471_s13 + $0x8] sm:$0xff]  ;;  %v254_v2 = vld [vmem:[%s3471_s13] sm:$0xff]  ;;  %v3002_v40 = vld [vmem:[%s4083_s3 + $0xb8] sm:$0xff]  ;;  %s3314_s14 = scalar_lea.vmem %s4040_s10, 256  ;;  %p3321_p0 = scmp.lt.s32.totalorder %s4040_s10, %s3319_s16 }
  0x19   : > { %v273_v3 = vpack.c.bf16 %v255_v1, %v255_v1  ;;  %v272_v4 = vpack.c.bf16 %v254_v2, %v254_v2  ;;  %561 = vperm.xlu0 %3226, %v527_v17   ;;  %566 = vperm.xlu1 %3227, %v528_v20   ;;  %v3000_v38 = vld [vmem:[%s4083_s3 + $0xa8] sm:$0xff]  ;;  %v3003_v39 = vld [vmem:[%s4083_s3 + $0xc0] sm:$0xff]  ;;  %v3005_v41 = vld [vmem:[%s4083_s3 + $0xd0] sm:$0xff]  ;;  %p3315_p11 = scmp.ne.s32.totalorder %s4040_s10, %s3314_s14  ;;  %p3322_p1 = scmp.lt.s32.totalorder %s3320_s17, %s3314_s14 }
  0x1a   : > { %v3004_v42 = vld [vmem:[%s4083_s3 + $0xc8] sm:$0xff]  ;;  %v3007_v43 = vld [vmem:[%s4083_s3 + $0xe0] sm:$0xff]  ;;  %v3006_v44 = vld [vmem:[%s4083_s3 + $0xd8] sm:$0xff] }
  0x1b   : > { %2928 = vmatprep.subr.msk.bf16.mxu0 %vm339_vm0, %v273_v3  ;;  %v341_v6 = vsel %vm339_vm0, %v272_v4, 0  ;;  %v3009_v45 = vld [vmem:[%s4083_s3 + $0xf0] sm:$0xff]  ;;  %v3008_v46 = vld [vmem:[%s4083_s3 + $0xe8] sm:$0xff]  ;;  %v3022_v47 = vld [vmem:[%s4085_s5 + $0x18] sm:$0xff]  ;;  %p3316_p12 = pnand %p3315_p11, %p3453_p5  ;;  %p3323_p2 = por %p3322_p1, %p3321_p0 }
  0x1c   : > { %347 = vmatpush1.bf16.msra.mxu0 %v341_v6  ;;  %v3010_v48 = vld [vmem:[%s4083_s3 + $0xf8] sm:$0xff]  ;;  %v3073_v49 = vld [vmem:[%s4083_s3 + $0x100] sm:$0xff]  ;;  %v3021_v50 = vld [vmem:[%s4085_s5 + $0x10] sm:$0xff] }
  0x1d   : > { %571 = vperm.xlu0 %3226, %v529_v19   ;;  %576 = vperm.xlu1 %3227, %v530_v22   ;;  %v3075_v51 = vld [vmem:[%s4083_s3 + $0x110] sm:$0xff]  ;;  %v3074_v52 = vld [vmem:[%s4083_s3 + $0x108] sm:$0xff]  ;;  %v3077_v53 = vld [vmem:[%s4083_s3 + $0x120] sm:$0xff]  ;;  %p3317_p13 = pneg %p3316_p12 }
  0x1e   : > { %v3076_v54 = vld [vmem:[%s4083_s3 + $0x118] sm:$0xff]  ;;  %v3079_v55 = vld [vmem:[%s4083_s3 + $0x130] sm:$0xff]  ;;  %v3078_v56 = vld [vmem:[%s4083_s3 + $0x128] sm:$0xff] }
  0x1f   : > { %2929 = vmatmul.mubr.msk.bf16.vlgmr.msra.gmra.mrb[0].mxu0 %vm314_vm1, %v3228_v5  ;;  %v3081_v57 = vld [vmem:[%s4083_s3 + $0x140] sm:$0xff]  ;;  %v3080_v58 = vld [vmem:[%s4083_s3 + $0x138] sm:$0xff]  ;;  %v3083_v59 = vld [vmem:[%s4083_s3 + $0x150] sm:$0xff]  ;;  %p3324_p3 = pnand %p3323_p2, %p3317_p13 }
  0x20   : > { %388 = vmatprep.mubr.bf16.mxu0 %v3378_v0  ;;  %v3082_v60 = vld [vmem:[%s4083_s3 + $0x148] sm:$0xff]  ;;  %v3085_v61 = vld [vmem:[%s4083_s3 + $0x160] sm:$0xff]  ;;  %v3084_v62 = vld [vmem:[%s4083_s3 + $0x158] sm:$0xff] }
  0x21   : > { %581 = vperm.xlu0 %3226, %v531_v21   ;;  %586 = vperm.xlu1 %3227, %v532_v24   ;;  %v3087_v63 = vld [vmem:[%s4083_s3 + $0x170] sm:$0xff]  ;;  %v3086_v1 = vld [vmem:[%s4083_s3 + $0x168] sm:$0xff]  ;;  %v3088_v3 = vld [vmem:[%s4083_s3 + $0x178] sm:$0xff] }
  0x22   : > { %v3100_v2 = vld [vmem:[%s4085_s5 + $0x28] sm:$0xff]  ;;  %v3151_v4 = vld [vmem:[%s4083_s3 + $0x180] sm:$0xff]  ;;  %v3153_v6 = vld [vmem:[%s4083_s3 + $0x190] sm:$0xff] }
  0x23   : > { %v3099_v5 = vld [vmem:[%s4085_s5 + $0x20] sm:$0xff]  ;;  %v3154_v15 = vld [vmem:[%s4083_s3 + $0x198] sm:$0xff]  ;;  %v3157_v16 = vld [vmem:[%s4083_s3 + $0x1b0] sm:$0xff] }
  0x24   : > { %v3156_v21 = vld [vmem:[%s4083_s3 + $0x1a8] sm:$0xff]  ;;  %v3159_v22 = vld [vmem:[%s4083_s3 + $0x1c0] sm:$0xff] }
  0x25   : > { %591 = vperm.xlu0 %3226, %v533_v23   ;;  %596 = vperm.xlu1 %3227, %v534_v26  }
  0x27   : > { %2930 = vmatmul.mubr.msk.bf16.gmra.mrb[4].mxu0 %vm314_vm1, %v3229_v7  ;;  %v3152_v7 = vld [vmem:[%s4083_s3 + $0x188] sm:$0xff] }
  0x28   : > { %398 = vmatprep.mubr.bf16.mxu0 %v3378_v0 }
  0x29   : > { %601 = vperm.xlu0 %3226, %v535_v25   ;;  %606 = vperm.xlu1 %3227, %v536_v28  }
  0x2d   : > { %611 = vperm.xlu0 %3226, %v537_v27   ;;  %616 = vperm.xlu1 %3227, %v538_v30   ;;  %v3161_v30 = vld [vmem:[%s4083_s3 + $0x1d0] sm:$0xff] }
  0x2f   : > { %2931 = vmatmul.mubr.msk.bf16.gmra.mrb[8].mxu0 %vm314_vm1, %v3230_v8  ;;  %v3155_v8 = vld [vmem:[%s4083_s3 + $0x1a0] sm:$0xff] }
  0x30   : > { %408 = vmatprep.mubr.bf16.mxu0 %v3378_v0 }
  0x31   : > { %839 = vperm.xlu0 %3226, %v831_v29   ;;  %834 = vperm.xlu1 %3227, %v830_v32   ;;  %v3158_v29 = vld [vmem:[%s4083_s3 + $0x1b8] sm:$0xff] }
  0x35   : > { %1185 = vperm.xlu0 %3226, %v2995_v31   ;;  %1190 = vperm.xlu1 %3227, %v2996_v34  }
  0x37   : > { %2932 = vmatmul.mubr.msk.bf16.gmra.mrb[12].mxu0 %vm314_vm1, %v3231_v9 }
  0x38   : > { %418 = vmatprep.mubr.bf16.mxu0 %v3378_v0 }
  0x39   : > { %1195 = vperm.xlu0 %3226, %v2997_v33   ;;  %1200 = vperm.xlu1 %3227, %v2998_v36   ;;  %v3163_v36 = vld [vmem:[%s4083_s3 + $0x1e0] sm:$0xff] }
  0x3d   : > { %1205 = vperm.xlu0 %3226, %v2999_v35   ;;  %1210 = vperm.xlu1 %3227, %v3000_v38   ;;  %v3160_v35 = vld [vmem:[%s4083_s3 + $0x1c8] sm:$0xff] }
  0x3f   : > { %2933 = vmatmul.mubr.msk.bf16.gmra.mrb[16].mxu0 %vm314_vm1, %v3232_v10 }
  0x40   : > { %428 = vmatprep.mubr.bf16.mxu0 %v3378_v0 }
  0x41   : > { %1215 = vperm.xlu0 %3226, %v3001_v37   ;;  %1220 = vperm.xlu1 %3227, %v3002_v40  }
  0x45   : > { %1225 = vperm.xlu0 %3226, %v3003_v39   ;;  %1230 = vperm.xlu1 %3227, %v3004_v42  }
  0x47   : > { %2934 = vmatmul.mubr.msk.bf16.gmra.mrb[20].mxu0 %vm314_vm1, %v3233_v11 }
  0x48   : > { %438 = vmatprep.mubr.bf16.mxu0 %v3378_v0 }
  0x49   : > { %1235 = vperm.xlu0 %3226, %v3005_v41   ;;  %1240 = vperm.xlu1 %3227, %v3006_v44   ;;  %v3165_v44 = vld [vmem:[%s4083_s3 + $0x1f0] sm:$0xff] }
  0x4d   : > { %1245 = vperm.xlu0 %3226, %v3007_v43   ;;  %1250 = vperm.xlu1 %3227, %v3008_v46   ;;  %v3162_v43 = vld [vmem:[%s4083_s3 + $0x1d8] sm:$0xff] }
  0x4f   : > { %2935 = vmatmul.mubr.msk.bf16.gmra.mrb[24].mxu0 %vm314_vm1, %v3234_v12 }
  0x50   : > { %448 = vmatprep.mubr.bf16.mxu0 %v3378_v0 }
  0x51   : > { %1255 = vperm.xlu0 %3226, %v3009_v45   ;;  %1260 = vperm.xlu1 %3227, %v3010_v48  }
  0x55   : > { %1485 = vperm.xlu0 %3226, %v3022_v47   ;;  %1480 = vperm.xlu1 %3227, %v3021_v50   ;;  %v3178_v50 = vld [vmem:[%s4085_s5 + $0x38] sm:$0xff] }
  0x57   : > { %2936 = vmatmul.mubr.msk.bf16.gmra.mrb[28].mxu0 %vm314_vm1, %v3235_v13 }
  0x58   : > { %880 = vmatprep.mubr.bf16.mxu0 %v3378_v0 }
  0x59   : > { %1831 = vperm.xlu0 %3226, %v3073_v49   ;;  %1836 = vperm.xlu1 %3227, %v3074_v52   ;;  %v3164_v49 = vld [vmem:[%s4083_s3 + $0x1e8] sm:$0xff] }
  0x5d   : > { %1841 = vperm.xlu0 %3226, %v3075_v51   ;;  %1846 = vperm.xlu1 %3227, %v3076_v54  }
  0x61   : > { %1851 = vperm.xlu0 %3226, %v3077_v53   ;;  %1856 = vperm.xlu1 %3227, %v3078_v56  }
  0x65   : > { %1861 = vperm.xlu0 %3226, %v3079_v55   ;;  %1866 = vperm.xlu1 %3227, %v3080_v58  }
  0x69   : > { %1871 = vperm.xlu0 %3226, %v3081_v57   ;;  %1876 = vperm.xlu1 %3227, %v3082_v60   ;;  %v3166_v57 = vld [vmem:[%s4083_s3 + $0x1f8] sm:$0xff] }
  0x6d   : > { %1881 = vperm.xlu0 %3226, %v3083_v59   ;;  %1886 = vperm.xlu1 %3227, %v3084_v62   ;;  %v3177_v62 = vld [vmem:[%s4085_s5 + $0x30] sm:$0xff] }
  0x71   : > { %1891 = vperm.xlu0 %3226, %v3085_v61   ;;  %1896 = vperm.xlu1 %3227, %v3086_v1  }
  0x75   : > { %1901 = vperm.xlu0 %3226, %v3087_v63   ;;  %1906 = vperm.xlu1 %3227, %v3088_v3  }
  0x79   : > { %2131 = vperm.xlu0 %3226, %v3100_v2   ;;  %2126 = vperm.xlu1 %3227, %v3099_v5  }
  0x7d   : > { %2477 = vperm.xlu0 %3226, %v3151_v4   ;;  %2482 = vperm.xlu1 %3227, %v3152_v7  }
  0x81   : > { %2487 = vperm.xlu0 %3226, %v3153_v6   ;;  %2492 = vperm.xlu1 %3227, %v3154_v15  }
  0x85   : > { %2497 = vperm.xlu0 %3226, %v3155_v8   ;;  %2502 = vperm.xlu1 %3227, %v3156_v21  }
  0x89   : > { %2507 = vperm.xlu0 %3226, %v3157_v16   ;;  %2512 = vperm.xlu1 %3227, %v3158_v29  }
  0x8d   : > { %2517 = vperm.xlu0 %3226, %v3159_v22   ;;  %2522 = vperm.xlu1 %3227, %v3160_v35  }
  0x91   : > { %2527 = vperm.xlu0 %3226, %v3161_v30   ;;  %2532 = vperm.xlu1 %3227, %v3162_v43   ;;  %v3239_v43 = vld [vmem:[%s4082_s2 + $0x18] sm:$0xff]  }
  0x95   : > { %2537 = vperm.xlu0 %3226, %v3163_v36   ;;  %2542 = vperm.xlu1 %3227, %v3164_v49  }
  0x99   : > { %2547 = vperm.xlu0 %3226, %v3165_v44   ;;  %2552 = vperm.xlu1 %3227, %v3166_v57   ;;  %v3240_v44 = vld [vmem:[%s4082_s2 + $0x20] sm:$0xff]   ;;  %v552_v57 = vpop.permute.xlu1 %551 }
  0x9d   : > { %2777 = vperm.xlu0 %3226, %v3178_v50   ;;  %2772 = vperm.xlu1 %3227, %v3177_v62  }
  0xf2   : > { %v380_v9 = vpop.f32.mrb[0].mxu0 }
  0xf3   : > { %v382_v10 = vpop.f32.mrb[1].mxu0  ;;  %v475_v12 = vmax.f32 %v380_v9, 0.0 }
  0xf4   : > { %v384_v11 = vpop.f32.mrb[2].mxu0  ;;  %v476_v17 = vmax.f32 %v382_v10, 0.0 }
  0xf5   : > { %v477_v13 = vmax.f32 %v384_v11, 0.0  ;;  %v386_v14 = vpop.f32.mrb[3].mxu0 }
  0xf6   : > { %v478_v18 = vmax.f32 %v386_v14, 0.0 }
  0xf7   : > { %v507_v19 = vpack.c.bf16 %v477_v13, %v475_v12 }
  0xf8   : > { %v508_v20 = vpack.c.bf16 %v478_v18, %v476_v17 }
  0xfa   : > { %v390_v23 = vpop.f32.mrb[4].mxu0  ;;  %667 = vmatprep.subr.bf16.mxu1 %v508_v20 }
  0xfb   : > { %v392_v24 = vpop.f32.mrb[5].mxu0  ;;  %668 = vmatpush1.bf16.msra.mxu1 %v507_v19  ;;  %v479_v26 = vmax.f32 %v390_v23, 0.0 }
  0xfc   : > { %v394_v25 = vpop.f32.mrb[6].mxu0  ;;  %v480_v31 = vmax.f32 %v392_v24, 0.0 }
  0xfd   : > { %v481_v27 = vmax.f32 %v394_v25, 0.0  ;;  %v396_v28 = vpop.f32.mrb[7].mxu0 }
  0xfe   : > { %v482_v32 = vmax.f32 %v396_v28, 0.0 }
  0xff   : > { %v509_v33 = vpack.c.bf16 %v481_v27, %v479_v26 }
 0x100   : > { %v510_v34 = vpack.c.bf16 %v482_v32, %v480_v31 }
 0x102   : > { %v400_v37 = vpop.f32.mrb[8].mxu0  ;;  %669 = vmatprep.subr.bf16.mxu1 %v510_v34 }
 0x103   : > { %v402_v38 = vpop.f32.mrb[9].mxu0  ;;  %670 = vmatpush1.bf16.msra.mxu1 %v509_v33  ;;  %v483_v40 = vmax.f32 %v400_v37, 0.0 }
 0x104   : > { %v404_v39 = vpop.f32.mrb[10].mxu0  ;;  %v484_v45 = vmax.f32 %v402_v38, 0.0 }
 0x105   : > { %v485_v41 = vmax.f32 %v404_v39, 0.0  ;;  %v406_v42 = vpop.f32.mrb[11].mxu0 }
 0x106   : > { %v486_v46 = vmax.f32 %v406_v42, 0.0  ;;  %v3238_v42 = vld [vmem:[%s4082_s2 + $0x10] sm:$0xff]  }
 0x107   : > { %v511_v47 = vpack.c.bf16 %v485_v41, %v483_v40  ;;  %v3236_v40 = vld [vmem:[%s4082_s2] sm:$0xff]   ;;  %v3237_v41 = vld [vmem:[%s4082_s2 + $0x8] sm:$0xff]  }
 0x108   : > { %v512_v48 = vpack.c.bf16 %v486_v46, %v484_v45  ;;  %v3241_v45 = vld [vmem:[%s4082_s2 + $0x28] sm:$0xff]   ;;  %v3242_v46 = vld [vmem:[%s4082_s2 + $0x30] sm:$0xff]  }
 0x10a   : > { %v410_v51 = vpop.f32.mrb[12].mxu0  ;;  %671 = vmatprep.subr.bf16.mxu1 %v512_v48  ;;  %v542_v48 = vpop.permute.xlu0 %541 }
 0x10b   : > { %v412_v52 = vpop.f32.mrb[13].mxu0  ;;  %672 = vmatpush1.bf16.msra.mxu1 %v511_v47  ;;  %v487_v54 = vmax.f32 %v410_v51, 0.0  ;;  %v3243_v47 = vld [vmem:[%s4082_s2 + $0x38] sm:$0xff]  }
 0x10c   : > { %v414_v53 = vpop.f32.mrb[14].mxu0  ;;  %v488_v58 = vmax.f32 %v412_v52, 0.0 }
 0x10d   : > { %v489_v55 = vmax.f32 %v414_v53, 0.0  ;;  %v416_v56 = vpop.f32.mrb[15].mxu0 }
 0x10e   : > { %v490_v59 = vmax.f32 %v416_v56, 0.0  ;;  %v547_v52 = vpop.permute.xlu0 %546 }
 0x10f   : > { %v513_v60 = vpack.c.bf16 %v489_v55, %v487_v54 }
 0x110   : > { %v514_v61 = vpack.c.bf16 %v490_v59, %v488_v58 }
 0x112   : > { %v420_v63 = vpop.f32.mrb[16].mxu0  ;;  %673 = vmatprep.subr.bf16.mxu1 %v514_v61 }
 0x113   : > { %v422_v1 = vpop.f32.mrb[17].mxu0  ;;  %674 = vmatpush1.bf16.msra.mxu1 %v513_v60  ;;  %v491_v3 = vmax.f32 %v420_v63, 0.0 }
 0x114   : > { %v424_v2 = vpop.f32.mrb[18].mxu0  ;;  %v492_v6 = vmax.f32 %v422_v1, 0.0 }
 0x115   : > { %v493_v4 = vmax.f32 %v424_v2, 0.0  ;;  %v426_v5 = vpop.f32.mrb[19].mxu0 }
 0x116   : > { %v494_v7 = vmax.f32 %v426_v5, 0.0  ;;  %v557_v5 = vpop.permute.xlu1 %556 }
 0x117   : > { %v515_v8 = vpack.c.bf16 %v493_v4, %v491_v3 }
 0x118   : > { %v516_v9 = vpack.c.bf16 %v494_v7, %v492_v6 }
 0x11a   : > { %v430_v10 = vpop.f32.mrb[20].mxu0  ;;  %675 = vmatprep.subr.bf16.mxu1 %v516_v9 }
 0x11b   : > { %v432_v11 = vpop.f32.mrb[21].mxu0  ;;  %676 = vmatpush1.bf16.msra.mxu1 %v515_v8  ;;  %v495_v13 = vmax.f32 %v430_v10, 0.0 }
 0x11c   : > { %v434_v12 = vpop.f32.mrb[22].mxu0  ;;  %v496_v16 = vmax.f32 %v432_v11, 0.0 }
 0x11d   : > { %v497_v14 = vmax.f32 %v434_v12, 0.0  ;;  %v436_v15 = vpop.f32.mrb[23].mxu0 }
 0x11e   : > { %v498_v17 = vmax.f32 %v436_v15, 0.0 }
 0x11f   : > { %v517_v18 = vpack.c.bf16 %v497_v14, %v495_v13 }
 0x120   : > { %v518_v19 = vpack.c.bf16 %v498_v17, %v496_v16  ;;  %v562_v16 = vpop.permute.xlu0 %561 }
 0x122   : > { %v440_v20 = vpop.f32.mrb[24].mxu0  ;;  %677 = vmatprep.subr.bf16.mxu1 %v518_v19 }
 0x123   : > { %v442_v21 = vpop.f32.mrb[25].mxu0  ;;  %678 = vmatpush1.bf16.msra.mxu1 %v517_v18  ;;  %v499_v23 = vmax.f32 %v440_v20, 0.0 }
 0x124   : > { %v444_v22 = vpop.f32.mrb[26].mxu0  ;;  %v500_v26 = vmax.f32 %v442_v21, 0.0  ;;  %v567_v21 = vpop.permute.xlu1 %566 }
 0x125   : > { %v501_v24 = vmax.f32 %v444_v22, 0.0  ;;  %v446_v25 = vpop.f32.mrb[27].mxu0 }
 0x126   : > { %v502_v27 = vmax.f32 %v446_v25, 0.0 }
 0x127   : > { %v519_v28 = vpack.c.bf16 %v501_v24, %v499_v23 }
 0x128   : > { %v520_v29 = vpack.c.bf16 %v502_v27, %v500_v26 }
 0x12a   : > { %v450_v30 = vpop.f32.mrb[28].mxu0  ;;  %679 = vmatprep.subr.bf16.mxu1 %v520_v29 }
 0x12b   : > { %v452_v31 = vpop.f32.mrb[29].mxu0  ;;  %680 = vmatpush1.bf16.msra.mxu1 %v519_v28  ;;  %v503_v33 = vmax.f32 %v450_v30, 0.0 }
 0x12c   : > { %v454_v32 = vpop.f32.mrb[30].mxu0  ;;  %v504_v36 = vmax.f32 %v452_v31, 0.0 }
 0x12d   : > { %v505_v34 = vmax.f32 %v454_v32, 0.0  ;;  %v456_v35 = vpop.f32.mrb[31].mxu0  ;;  %v572_v32 = vpop.permute.xlu0 %571 }
 0x12e   : > { %v506_v37 = vmax.f32 %v456_v35, 0.0 }
 0x12f   : > { %v521_v38 = vpack.c.bf16 %v505_v34, %v503_v33 }
 0x130   : > { %v522_v39 = vpack.c.bf16 %v506_v37, %v504_v36  ;;  %v577_v37 = vpop.permute.xlu1 %576 }
 0x132   : > { %681 = vmatprep.subr.bf16.mxu1 %v522_v39 }
 0x133   : > { %682 = vmatpush1.bf16.msra.mxu1 %v521_v38 }
 0x136   : > { %700 = vmatmul.mubr.bf16.vlgmr.msra.gmra.mrb[0].mxu1 %v3236_v40 }
 0x137   : > { %709 = vmatprep.mubr.bf16.mxu1 %v3378_v0 }
 0x13e   : > { %710 = vmatmul.mubr.bf16.gmra.mrb[4].mxu1 %v3237_v41 }
 0x13f   : > { %719 = vmatprep.mubr.bf16.mxu1 %v3378_v0 }
 0x146   : > { %720 = vmatmul.mubr.bf16.gmra.mrb[8].mxu1 %v3238_v42 }
 0x147   : > { %729 = vmatprep.mubr.bf16.mxu1 %v3378_v0 }
 0x14e   : > { %730 = vmatmul.mubr.bf16.gmra.mrb[12].mxu1 %v3239_v43 }
 0x14f   : > { %739 = vmatprep.mubr.bf16.mxu1 %v3378_v0 }
 0x156   : > { %740 = vmatmul.mubr.bf16.gmra.mrb[16].mxu1 %v3240_v44 }
 0x157   : > { %749 = vmatprep.mubr.bf16.mxu1 %v3378_v0 }
 0x15e   : > { %750 = vmatmul.mubr.bf16.gmra.mrb[20].mxu1 %v3241_v45 }
 0x15f   : > { %759 = vmatprep.mubr.bf16.mxu1 %v3378_v0 }
 0x166   : > { %760 = vmatmul.mubr.bf16.gmra.mrb[24].mxu1 %v3242_v46 }
 0x167   : > { %769 = vmatprep.mubr.bf16.mxu1 %v3378_v0 }
 0x16e   : > { %770 = vmatmul.mubr.bf16.gmra.mrb[28].mxu1 %v3243_v47 }
 0x16f   : > { %1343 = vmatprep.mubr.bf16.mxu1 %v3378_v0 }
 0x209   : > { %v701_v49 = vpop.f32.mrb[0].mxu1 }
 0x20a   : > { %v702_v50 = vadd.f32 %v701_v49, %v542_v48  ;;  %v703_v51 = vpop.f32.mrb[1].mxu1 }
 0x20b   : > { %v704_v53 = vadd.f32 %v703_v51, %v542_v48  ;;  %v705_v54 = vpop.f32.mrb[2].mxu1  ;;  %v582_v48 = vpop.permute.xlu0 %581 }
 0x20c   : > { %v706_v55 = vadd.f32 %v705_v54, %v547_v52  ;;  %v707_v56 = vpop.f32.mrb[3].mxu1  ;;  %v782_v59 = vmax.f32 %v702_v50, 0.0 }
 0x20d   : > { %v708_v58 = vadd.f32 %v707_v56, %v547_v52  ;;  %v783_v61 = vmax.f32 %v704_v53, 0.0  ;;  %v587_v53 = vpop.permute.xlu1 %586 }
 0x20e   : > { %v784_v60 = vmax.f32 %v706_v55, 0.0 }
 0x20f   : > { %v785_v62 = vmax.f32 %v708_v58, 0.0 }
 0x210   : > { %v814_v63 = vpack.c.bf16 %v784_v60, %v782_v59 }
 0x211   : > { %v815_v1 = vpack.c.bf16 %v785_v62, %v783_v61  ;;  %v711_v2 = vpop.f32.mrb[4].mxu1 }
 0x212   : > { %v712_v3 = vadd.f32 %v711_v2, %v552_v57  ;;  %v713_v4 = vpop.f32.mrb[5].mxu1 }
 0x213   : > { %v714_v6 = vadd.f32 %v713_v4, %v552_v57  ;;  %v715_v7 = vpop.f32.mrb[6].mxu1  ;;  %848 = vmatprep.subr.bf16.mxu0 %v815_v1  ;;  %v592_v1 = vpop.permute.xlu0 %591 }
 0x214   : > { %v716_v8 = vadd.f32 %v715_v7, %v557_v5  ;;  %v717_v9 = vpop.f32.mrb[7].mxu1  ;;  %849 = vmatpush1.bf16.msra.mxu0 %v814_v63  ;;  %v786_v11 = vmax.f32 %v712_v3, 0.0 }
 0x215   : > { %v718_v10 = vadd.f32 %v717_v9, %v557_v5  ;;  %v787_v13 = vmax.f32 %v714_v6, 0.0  ;;  %v597_v6 = vpop.permute.xlu1 %596 }
 0x216   : > { %v788_v12 = vmax.f32 %v716_v8, 0.0 }
 0x217   : > { %v789_v14 = vmax.f32 %v718_v10, 0.0 }
 0x218   : > { %v816_v15 = vpack.c.bf16 %v788_v12, %v786_v11 }
 0x219   : > { %v817_v17 = vpack.c.bf16 %v789_v14, %v787_v13  ;;  %v721_v18 = vpop.f32.mrb[8].mxu1 }
 0x21a   : > { %v722_v19 = vadd.f32 %v721_v18, %v562_v16  ;;  %v723_v20 = vpop.f32.mrb[9].mxu1 }
 0x21b   : > { %v724_v22 = vadd.f32 %v723_v20, %v562_v16  ;;  %v725_v23 = vpop.f32.mrb[10].mxu1  ;;  %850 = vmatprep.subr.bf16.mxu0 %v817_v17  ;;  %v602_v17 = vpop.permute.xlu0 %601 }
 0x21c   : > { %v726_v24 = vadd.f32 %v725_v23, %v567_v21  ;;  %v727_v25 = vpop.f32.mrb[11].mxu1  ;;  %851 = vmatpush1.bf16.msra.mxu0 %v816_v15  ;;  %v790_v27 = vmax.f32 %v722_v19, 0.0 }
 0x21d   : > { %v728_v26 = vadd.f32 %v727_v25, %v567_v21  ;;  %v791_v29 = vmax.f32 %v724_v22, 0.0  ;;  %v607_v22 = vpop.permute.xlu1 %606 }
 0x21e   : > { %v792_v28 = vmax.f32 %v726_v24, 0.0 }
 0x21f   : > { %v793_v30 = vmax.f32 %v728_v26, 0.0 }
 0x220   : > { %v818_v31 = vpack.c.bf16 %v792_v28, %v790_v27 }
 0x221   : > { %v819_v33 = vpack.c.bf16 %v793_v30, %v791_v29  ;;  %v731_v34 = vpop.f32.mrb[12].mxu1 }
 0x222   : > { %v732_v35 = vadd.f32 %v731_v34, %v572_v32  ;;  %v733_v36 = vpop.f32.mrb[13].mxu1 }
 0x223   : > { %v734_v38 = vadd.f32 %v733_v36, %v572_v32  ;;  %v735_v39 = vpop.f32.mrb[14].mxu1  ;;  %852 = vmatprep.subr.bf16.mxu0 %v819_v33  ;;  %v612_v33 = vpop.permute.xlu0 %611 }
 0x224   : > { %v736_v40 = vadd.f32 %v735_v39, %v577_v37  ;;  %v737_v41 = vpop.f32.mrb[15].mxu1  ;;  %853 = vmatpush1.bf16.msra.mxu0 %v818_v31  ;;  %v794_v43 = vmax.f32 %v732_v35, 0.0 }
 0x225   : > { %v738_v42 = vadd.f32 %v737_v41, %v577_v37  ;;  %v795_v45 = vmax.f32 %v734_v38, 0.0  ;;  %v617_v38 = vpop.permute.xlu1 %616 }
 0x226   : > { %v796_v44 = vmax.f32 %v736_v40, 0.0 }
 0x227   : > { %v797_v46 = vmax.f32 %v738_v42, 0.0 }
 0x228   : > { %v820_v47 = vpack.c.bf16 %v796_v44, %v794_v43 }
 0x229   : > { %v821_v49 = vpack.c.bf16 %v797_v46, %v795_v45  ;;  %v741_v50 = vpop.f32.mrb[16].mxu1 }
 0x22a   : > { %v742_v51 = vadd.f32 %v741_v50, %v582_v48  ;;  %v743_v52 = vpop.f32.mrb[17].mxu1  ;;  %v3244_v50 = vld [vmem:[%s4084_s4] sm:$0xff]  }
 0x22b   : > { %v744_v54 = vadd.f32 %v743_v52, %v582_v48  ;;  %v745_v55 = vpop.f32.mrb[18].mxu1  ;;  %854 = vmatprep.subr.bf16.mxu0 %v821_v49 }
 0x22c   : > { %v746_v56 = vadd.f32 %v745_v55, %v587_v53  ;;  %v747_v57 = vpop.f32.mrb[19].mxu1  ;;  %855 = vmatpush1.bf16.msra.mxu0 %v820_v47  ;;  %v798_v59 = vmax.f32 %v742_v51, 0.0 }
 0x22d   : > { %v748_v58 = vadd.f32 %v747_v57, %v587_v53  ;;  %v799_v61 = vmax.f32 %v744_v54, 0.0  ;;  %v840_v53 = vpop.permute.xlu0 %839 }
 0x22e   : > { %v800_v60 = vmax.f32 %v746_v56, 0.0 }
 0x22f   : > { %v801_v62 = vmax.f32 %v748_v58, 0.0 }
 0x230   : > { %v822_v63 = vpack.c.bf16 %v800_v60, %v798_v59 }
 0x231   : > { %v823_v2 = vpack.c.bf16 %v801_v62, %v799_v61  ;;  %v751_v3 = vpop.f32.mrb[20].mxu1  ;;  %v835_v61 = vpop.permute.xlu1 %834 }
 0x232   : > { %v752_v4 = vadd.f32 %v751_v3, %v592_v1  ;;  %v753_v5 = vpop.f32.mrb[21].mxu1 }
 0x233   : > { %v754_v7 = vadd.f32 %v753_v5, %v592_v1  ;;  %v755_v8 = vpop.f32.mrb[22].mxu1  ;;  %856 = vmatprep.subr.bf16.mxu0 %v823_v2  ;;  %v3312_v1 = vld [vmem:[%s3471_s13] sm:$0xff] }
 0x234   : > { %v756_v9 = vadd.f32 %v755_v8, %v597_v6  ;;  %v757_v10 = vpop.f32.mrb[23].mxu1  ;;  %857 = vmatpush1.bf16.msra.mxu0 %v822_v63  ;;  %v802_v12 = vmax.f32 %v752_v4, 0.0  ;;  %v3313_v4 = vld [vmem:[%s3471_s13 + $0x8] sm:$0xff] }
 0x235   : > { %v758_v11 = vadd.f32 %v757_v10, %v597_v6  ;;  %v803_v14 = vmax.f32 %v754_v7, 0.0 }
 0x236   : > { %v804_v13 = vmax.f32 %v756_v9, 0.0 }
 0x237   : > { %v805_v15 = vmax.f32 %v758_v11, 0.0  ;;  %v3245_v11 = vld [vmem:[%s4081_s1 + $0x40] sm:$0xff]  }
 0x238   : > { %v824_v16 = vpack.c.bf16 %v804_v13, %v802_v12  ;;  %v3246_v12 = vld [vmem:[%s4081_s1 + $0x48] sm:$0xff]   ;;  %v3247_v13 = vld [vmem:[%s4081_s1 + $0x50] sm:$0xff]  }
 0x239   : > { %v825_v18 = vpack.c.bf16 %v805_v15, %v803_v14  ;;  %v761_v19 = vpop.f32.mrb[24].mxu1  ;;  %v3248_v14 = vld [vmem:[%s4081_s1 + $0x58] sm:$0xff]   ;;  %v3249_v15 = vld [vmem:[%s4081_s1 + $0x60] sm:$0xff]  }
 0x23a   : > { %v762_v20 = vadd.f32 %v761_v19, %v602_v17  ;;  %v763_v21 = vpop.f32.mrb[25].mxu1 }
 0x23b   : > { %v764_v23 = vadd.f32 %v763_v21, %v602_v17  ;;  %v765_v24 = vpop.f32.mrb[26].mxu1  ;;  %858 = vmatprep.subr.bf16.mxu0 %v825_v18  ;;  %v3251_v17 = vld [vmem:[%s4081_s1 + $0x70] sm:$0xff]   ;;  %v3252_v18 = vld [vmem:[%s4081_s1 + $0x78] sm:$0xff]  }
 0x23c   : > { %v766_v25 = vadd.f32 %v765_v24, %v607_v22  ;;  %v767_v26 = vpop.f32.mrb[27].mxu1  ;;  %859 = vmatpush1.bf16.msra.mxu0 %v824_v16  ;;  %v806_v28 = vmax.f32 %v762_v20, 0.0  ;;  %v3250_v16 = vld [vmem:[%s4081_s1 + $0x68] sm:$0xff]  }
 0x23d   : > { %v768_v27 = vadd.f32 %v767_v26, %v607_v22  ;;  %v807_v30 = vmax.f32 %v764_v23, 0.0 }
 0x23e   : > { %v808_v29 = vmax.f32 %v766_v25, 0.0 }
 0x23f   : > { %v809_v31 = vmax.f32 %v768_v27, 0.0 }
 0x240   : > { %v826_v32 = vpack.c.bf16 %v808_v29, %v806_v28 }
 0x241   : > { %v827_v34 = vpack.c.bf16 %v809_v31, %v807_v30  ;;  %v771_v35 = vpop.f32.mrb[28].mxu1 }
 0x242   : > { %v772_v36 = vadd.f32 %v771_v35, %v612_v33  ;;  %v773_v37 = vpop.f32.mrb[29].mxu1 }
 0x243   : > { %v774_v39 = vadd.f32 %v773_v37, %v612_v33  ;;  %v775_v40 = vpop.f32.mrb[30].mxu1  ;;  %860 = vmatprep.subr.bf16.mxu0 %v827_v34 }
 0x244   : > { %v776_v41 = vadd.f32 %v775_v40, %v617_v38  ;;  %v777_v42 = vpop.f32.mrb[31].mxu1  ;;  %861 = vmatpush1.bf16.msra.mxu0 %v826_v32  ;;  %v810_v44 = vmax.f32 %v772_v36, 0.0 }
 0x245   : > { %v778_v43 = vadd.f32 %v777_v42, %v617_v38  ;;  %v811_v46 = vmax.f32 %v774_v39, 0.0 }
 0x246   : > { %v812_v45 = vmax.f32 %v776_v41, 0.0 }
 0x247   : > { %v813_v47 = vmax.f32 %v778_v43, 0.0 }
 0x248   : > { %v828_v48 = vpack.c.bf16 %v812_v45, %v810_v44 }
 0x249   : > { %v829_v49 = vpack.c.bf16 %v813_v47, %v811_v46 }
 0x24b   : > { %862 = vmatprep.subr.bf16.mxu0 %v829_v49 }
 0x24c   : > { %863 = vmatpush1.bf16.msra.mxu0 %v828_v48 }
 0x24f   : > { %881 = vmatmul.mubr.bf16.vlgmr.msra.gmra.mrb[32].mxu0 %v3244_v50 }
 0x250   : > { %1020 = vmatprep.mubr.bf16.mxu0 %v3378_v0 }
 0x322   : > { %v882_v51 = vpop.f32.mrb[32].mxu0 }
 0x323   : > { %v884_v52 = vpop.f32.mrb[33].mxu0  ;;  %v883_v63 = vadd.f32 %v882_v51, %v835_v61 }
 0x324   : > { %v886_v54 = vpop.f32.mrb[34].mxu0  ;;  %v885_v3 = vadd.f32 %v884_v52, %v835_v61 }
 0x325   : > { %v887_v55 = vadd.f32 %v886_v54, %v840_v53  ;;  %v888_v56 = vpop.f32.mrb[35].mxu0 }
 0x326   : > { %v889_v57 = vadd.f32 %v888_v56, %v840_v53 }
 0x327   : > { %v891_v58 = vmul.f32 1.442695, %v887_v55 }
 0x328   : > { %v893_v59 = vmul.f32 1.442695, %v889_v57 }
 0x329   : > { %3296 = vpow2.f32 %v891_v58 }
 0x32a   : > { %3298 = vpow2.f32 %v893_v59 }
 0x333   : > { %v3297_v60 = vpop.eup %3296 }
 0x334   : > { %v3299_v62 = vpop.eup %3298  ;;  %v895_v2 = vmul.f32 %v3312_v1, %v3297_v60 }
 0x335   : > { %v896_v5 = vmul.f32 %v3313_v4, %v3299_v62 }
 0x336   : > { %v3771_v6 = vadd.f32 %v895_v2, %v883_v63 }
 0x337   : > { %v3773_v7 = vadd.f32 %v896_v5, %v885_v3 }
 0x338   : > { %v916_v8 = vpack.c.bf16 %v3771_v6, %v3771_v6 }
 0x339   : > { %v917_v9 = vpack.c.bf16 %v3773_v7, %v3773_v7 }
 0x33a   : > { %v983_v10 = vsel %vm339_vm0, %v916_v8, 0 }
 0x33b   : > { %2970 = vmatprep.subr.msk.bf16.mxu0 %vm339_vm0, %v917_v9 }
 0x33c   : > { %989 = vmatpush1.bf16.msra.mxu0 %v983_v10 }
 0x33f   : > { %2971 = vmatmul.mubr.msk.bf16.vlgmr.msra.gmra.mrb[36].mxu0 %vm314_vm1, %v3245_v11 }
 0x340   : > { %1030 = vmatprep.mubr.bf16.mxu0 %v3378_v0 }
 0x347   : > { %2972 = vmatmul.mubr.msk.bf16.gmra.mrb[40].mxu0 %vm314_vm1, %v3246_v12 }
 0x348   : > { %1040 = vmatprep.mubr.bf16.mxu0 %v3378_v0 }
 0x34f   : > { %2973 = vmatmul.mubr.msk.bf16.gmra.mrb[44].mxu0 %vm314_vm1, %v3247_v13 }
 0x350   : > { %1050 = vmatprep.mubr.bf16.mxu0 %v3378_v0 }
 0x357   : > { %2974 = vmatmul.mubr.msk.bf16.gmra.mrb[48].mxu0 %vm314_vm1, %v3248_v14 }
 0x358   : > { %1060 = vmatprep.mubr.bf16.mxu0 %v3378_v0 }
 0x35f   : > { %2975 = vmatmul.mubr.msk.bf16.gmra.mrb[52].mxu0 %vm314_vm1, %v3249_v15 }
 0x360   : > { %1070 = vmatprep.mubr.bf16.mxu0 %v3378_v0 }
 0x367   : > { %2976 = vmatmul.mubr.msk.bf16.gmra.mrb[56].mxu0 %vm314_vm1, %v3250_v16 }
 0x368   : > { %1080 = vmatprep.mubr.bf16.mxu0 %v3378_v0 }
 0x36f   : > { %2977 = vmatmul.mubr.msk.bf16.gmra.mrb[60].mxu0 %vm314_vm1, %v3251_v17 }
 0x370   : > { %1090 = vmatprep.mubr.bf16.mxu0 %v3378_v0 }
 0x377   : > { %2978 = vmatmul.mubr.msk.bf16.gmra.mrb[64].mxu0 %vm314_vm1, %v3252_v18 }
 0x378   : > { %1526 = vmatprep.mubr.bf16.mxu0 %v3378_v0 }
 0x412   : > { %v1022_v19 = vpop.f32.mrb[36].mxu0 }
 0x413   : > { %v1024_v20 = vpop.f32.mrb[37].mxu0  ;;  %v1118_v22 = vmax.f32 %v1022_v19, 0.0 }
 0x414   : > { %v1026_v21 = vpop.f32.mrb[38].mxu0  ;;  %v1119_v25 = vmax.f32 %v1024_v20, 0.0 }
 0x415   : > { %v1120_v23 = vmax.f32 %v1026_v21, 0.0  ;;  %v1028_v24 = vpop.f32.mrb[39].mxu0 }
 0x416   : > { %v1121_v26 = vmax.f32 %v1028_v24, 0.0 }
 0x417   : > { %v1150_v27 = vpack.c.bf16 %v1120_v23, %v1118_v22 }
 0x418   : > { %v1151_v28 = vpack.c.bf16 %v1121_v26, %v1119_v25 }
 0x41a   : > { %v1032_v29 = vpop.f32.mrb[40].mxu0  ;;  %1311 = vmatprep.subr.bf16.mxu1 %v1151_v28 }
 0x41b   : > { %v1034_v30 = vpop.f32.mrb[41].mxu0  ;;  %1312 = vmatpush1.bf16.msra.mxu1 %v1150_v27  ;;  %v1122_v32 = vmax.f32 %v1032_v29, 0.0 }
 0x41c   : > { %v1036_v31 = vpop.f32.mrb[42].mxu0  ;;  %v1123_v35 = vmax.f32 %v1034_v30, 0.0 }
 0x41d   : > { %v1124_v33 = vmax.f32 %v1036_v31, 0.0  ;;  %v1038_v34 = vpop.f32.mrb[43].mxu0 }
 0x41e   : > { %v1125_v36 = vmax.f32 %v1038_v34, 0.0 }
 0x41f   : > { %v1152_v37 = vpack.c.bf16 %v1124_v33, %v1122_v32 }
 0x420   : > { %v1153_v38 = vpack.c.bf16 %v1125_v36, %v1123_v35 }
 0x422   : > { %v1042_v39 = vpop.f32.mrb[44].mxu0  ;;  %1313 = vmatprep.subr.bf16.mxu1 %v1153_v38  ;;  %v3253_v38 = vld [vmem:[%s4082_s2 + $0x40] sm:$0xff]  }
 0x423   : > { %v1044_v40 = vpop.f32.mrb[45].mxu0  ;;  %1314 = vmatpush1.bf16.msra.mxu1 %v1152_v37  ;;  %v1126_v42 = vmax.f32 %v1042_v39, 0.0  ;;  %v3254_v39 = vld [vmem:[%s4082_s2 + $0x48] sm:$0xff]  }
 0x424   : > { %v1046_v41 = vpop.f32.mrb[46].mxu0  ;;  %v1127_v45 = vmax.f32 %v1044_v40, 0.0  ;;  %v3255_v40 = vld [vmem:[%s4082_s2 + $0x50] sm:$0xff]  }
 0x425   : > { %v1128_v43 = vmax.f32 %v1046_v41, 0.0  ;;  %v1048_v44 = vpop.f32.mrb[47].mxu0  ;;  %v3256_v41 = vld [vmem:[%s4082_s2 + $0x58] sm:$0xff]  }
 0x426   : > { %v1129_v46 = vmax.f32 %v1048_v44, 0.0  ;;  %v3259_v44 = vld [vmem:[%s4082_s2 + $0x70] sm:$0xff]  }
 0x427   : > { %v1154_v47 = vpack.c.bf16 %v1128_v43, %v1126_v42  ;;  %v3257_v42 = vld [vmem:[%s4082_s2 + $0x60] sm:$0xff]   ;;  %v3258_v43 = vld [vmem:[%s4082_s2 + $0x68] sm:$0xff]  }
 0x428   : > { %v1155_v48 = vpack.c.bf16 %v1129_v46, %v1127_v45  ;;  %v3260_v45 = vld [vmem:[%s4082_s2 + $0x78] sm:$0xff]   ;;  %v1186_v46 = vpop.permute.xlu0 %1185 }
 0x42a   : > { %v1052_v49 = vpop.f32.mrb[48].mxu0  ;;  %1315 = vmatprep.subr.bf16.mxu1 %v1155_v48 }
 0x42b   : > { %v1054_v50 = vpop.f32.mrb[49].mxu0  ;;  %1316 = vmatpush1.bf16.msra.mxu1 %v1154_v47  ;;  %v1130_v52 = vmax.f32 %v1052_v49, 0.0 }
 0x42c   : > { %v1056_v51 = vpop.f32.mrb[50].mxu0  ;;  %v1131_v55 = vmax.f32 %v1054_v50, 0.0  ;;  %v1191_v50 = vpop.permute.xlu1 %1190 }
 0x42d   : > { %v1132_v53 = vmax.f32 %v1056_v51, 0.0  ;;  %v1058_v54 = vpop.f32.mrb[51].mxu0 }
 0x42e   : > { %v1133_v56 = vmax.f32 %v1058_v54, 0.0 }
 0x42f   : > { %v1156_v57 = vpack.c.bf16 %v1132_v53, %v1130_v52 }
 0x430   : > { %v1157_v58 = vpack.c.bf16 %v1133_v56, %v1131_v55 }
 0x432   : > { %v1062_v59 = vpop.f32.mrb[52].mxu0  ;;  %1317 = vmatprep.subr.bf16.mxu1 %v1157_v58 }
 0x433   : > { %v1064_v60 = vpop.f32.mrb[53].mxu0  ;;  %1318 = vmatpush1.bf16.msra.mxu1 %v1156_v57  ;;  %v1134_v62 = vmax.f32 %v1062_v59, 0.0 }
 0x434   : > { %v1066_v61 = vpop.f32.mrb[54].mxu0  ;;  %v1135_v2 = vmax.f32 %v1064_v60, 0.0 }
 0x435   : > { %v1136_v63 = vmax.f32 %v1066_v61, 0.0  ;;  %v1068_v1 = vpop.f32.mrb[55].mxu0  ;;  %v1196_v61 = vpop.permute.xlu0 %1195 }
 0x436   : > { %v1137_v3 = vmax.f32 %v1068_v1, 0.0 }
 0x437   : > { %v1158_v4 = vpack.c.bf16 %v1136_v63, %v1134_v62 }
 0x438   : > { %v1159_v5 = vpack.c.bf16 %v1137_v3, %v1135_v2  ;;  %v1201_v3 = vpop.permute.xlu1 %1200 }
 0x43a   : > { %v1072_v8 = vpop.f32.mrb[56].mxu0  ;;  %1319 = vmatprep.subr.bf16.mxu1 %v1159_v5 }
 0x43b   : > { %v1074_v9 = vpop.f32.mrb[57].mxu0  ;;  %1320 = vmatpush1.bf16.msra.mxu1 %v1158_v4  ;;  %v1138_v11 = vmax.f32 %v1072_v8, 0.0 }
 0x43c   : > { %v1076_v10 = vpop.f32.mrb[58].mxu0  ;;  %v1139_v14 = vmax.f32 %v1074_v9, 0.0 }
 0x43d   : > { %v1140_v12 = vmax.f32 %v1076_v10, 0.0  ;;  %v1078_v13 = vpop.f32.mrb[59].mxu0 }
 0x43e   : > { %v1141_v15 = vmax.f32 %v1078_v13, 0.0 }
 0x43f   : > { %v1160_v16 = vpack.c.bf16 %v1140_v12, %v1138_v11 }
 0x440   : > { %v1161_v17 = vpack.c.bf16 %v1141_v15, %v1139_v14 }
 0x442   : > { %v1082_v18 = vpop.f32.mrb[60].mxu0  ;;  %1321 = vmatprep.subr.bf16.mxu1 %v1161_v17 }
 0x443   : > { %v1084_v19 = vpop.f32.mrb[61].mxu0  ;;  %1322 = vmatpush1.bf16.msra.mxu1 %v1160_v16  ;;  %v1142_v21 = vmax.f32 %v1082_v18, 0.0  ;;  %v1206_v16 = vpop.permute.xlu0 %1205 }
 0x444   : > { %v1086_v20 = vpop.f32.mrb[62].mxu0  ;;  %v1143_v24 = vmax.f32 %v1084_v19, 0.0 }
 0x445   : > { %v1144_v22 = vmax.f32 %v1086_v20, 0.0  ;;  %v1088_v23 = vpop.f32.mrb[63].mxu0 }
 0x446   : > { %v1145_v25 = vmax.f32 %v1088_v23, 0.0 }
 0x447   : > { %v1162_v26 = vpack.c.bf16 %v1144_v22, %v1142_v21  ;;  %v1211_v21 = vpop.permute.xlu1 %1210 }
 0x448   : > { %v1163_v27 = vpack.c.bf16 %v1145_v25, %v1143_v24 }
 0x44a   : > { %v1092_v28 = vpop.f32.mrb[64].mxu0  ;;  %1323 = vmatprep.subr.bf16.mxu1 %v1163_v27 }
 0x44b   : > { %v1094_v29 = vpop.f32.mrb[65].mxu0  ;;  %1324 = vmatpush1.bf16.msra.mxu1 %v1162_v26  ;;  %v1146_v31 = vmax.f32 %v1092_v28, 0.0 }
 0x44c   : > { %v1096_v30 = vpop.f32.mrb[66].mxu0  ;;  %v1147_v34 = vmax.f32 %v1094_v29, 0.0 }
 0x44d   : > { %v1148_v32 = vmax.f32 %v1096_v30, 0.0  ;;  %v1098_v33 = vpop.f32.mrb[67].mxu0 }
 0x44e   : > { %v1149_v35 = vmax.f32 %v1098_v33, 0.0 }
 0x44f   : > { %v1164_v36 = vpack.c.bf16 %v1148_v32, %v1146_v31  ;;  %v1216_v32 = vpop.permute.xlu0 %1215 }
 0x450   : > { %v1165_v37 = vpack.c.bf16 %v1149_v35, %v1147_v34 }
 0x452   : > { %1325 = vmatprep.subr.bf16.mxu1 %v1165_v37  ;;  %v1221_v37 = vpop.permute.xlu1 %1220 }
 0x453   : > { %1326 = vmatpush1.bf16.msra.mxu1 %v1164_v36 }
 0x456   : > { %1344 = vmatmul.mubr.bf16.vlgmr.msra.gmra.mrb[32].mxu1 %v3253_v38 }
 0x457   : > { %1353 = vmatprep.mubr.bf16.mxu1 %v3378_v0 }
 0x45e   : > { %1354 = vmatmul.mubr.bf16.gmra.mrb[36].mxu1 %v3254_v39 }
 0x45f   : > { %1363 = vmatprep.mubr.bf16.mxu1 %v3378_v0 }
 0x466   : > { %1364 = vmatmul.mubr.bf16.gmra.mrb[40].mxu1 %v3255_v40 }
 0x467   : > { %1373 = vmatprep.mubr.bf16.mxu1 %v3378_v0 }
 0x46e   : > { %1374 = vmatmul.mubr.bf16.gmra.mrb[44].mxu1 %v3256_v41 }
 0x46f   : > { %1383 = vmatprep.mubr.bf16.mxu1 %v3378_v0 }
 0x476   : > { %1384 = vmatmul.mubr.bf16.gmra.mrb[48].mxu1 %v3257_v42 }
 0x477   : > { %1393 = vmatprep.mubr.bf16.mxu1 %v3378_v0 }
 0x47e   : > { %1394 = vmatmul.mubr.bf16.gmra.mrb[52].mxu1 %v3258_v43 }
 0x47f   : > { %1403 = vmatprep.mubr.bf16.mxu1 %v3378_v0 }
 0x486   : > { %1404 = vmatmul.mubr.bf16.gmra.mrb[56].mxu1 %v3259_v44 }
 0x487   : > { %1413 = vmatprep.mubr.bf16.mxu1 %v3378_v0 }
 0x48e   : > { %1414 = vmatmul.mubr.bf16.gmra.mrb[60].mxu1 %v3260_v45 }
 0x48f   : > { %1989 = vmatprep.mubr.bf16.mxu1 %v3378_v0 }
 0x529   : > { %v1345_v47 = vpop.f32.mrb[32].mxu1 }
 0x52a   : > { %v1346_v48 = vadd.f32 %v1345_v47, %v1186_v46  ;;  %v1347_v49 = vpop.f32.mrb[33].mxu1 }
 0x52b   : > { %v1348_v51 = vadd.f32 %v1347_v49, %v1186_v46  ;;  %v1349_v52 = vpop.f32.mrb[34].mxu1 }
 0x52c   : > { %v1350_v53 = vadd.f32 %v1349_v52, %v1191_v50  ;;  %v1351_v54 = vpop.f32.mrb[35].mxu1  ;;  %v1427_v56 = vmax.f32 %v1346_v48, 0.0  ;;  %v1226_v48 = vpop.permute.xlu0 %1225 }
 0x52d   : > { %v1352_v55 = vadd.f32 %v1351_v54, %v1191_v50  ;;  %v1428_v58 = vmax.f32 %v1348_v51, 0.0 }
 0x52e   : > { %v1429_v57 = vmax.f32 %v1350_v53, 0.0  ;;  %v1231_v53 = vpop.permute.xlu1 %1230 }
 0x52f   : > { %v1430_v59 = vmax.f32 %v1352_v55, 0.0 }
 0x530   : > { %v1459_v60 = vpack.c.bf16 %v1429_v57, %v1427_v56 }
 0x531   : > { %v1460_v62 = vpack.c.bf16 %v1430_v59, %v1428_v58  ;;  %v1355_v63 = vpop.f32.mrb[36].mxu1 }
 0x532   : > { %v1356_v1 = vadd.f32 %v1355_v63, %v1196_v61  ;;  %v1357_v2 = vpop.f32.mrb[37].mxu1 }
 0x533   : > { %v1358_v4 = vadd.f32 %v1357_v2, %v1196_v61  ;;  %v1359_v5 = vpop.f32.mrb[38].mxu1  ;;  %1494 = vmatprep.subr.bf16.mxu0 %v1460_v62 }
 0x534   : > { %v1360_v8 = vadd.f32 %v1359_v5, %v1201_v3  ;;  %v1361_v9 = vpop.f32.mrb[39].mxu1  ;;  %1495 = vmatpush1.bf16.msra.mxu0 %v1459_v60  ;;  %v1431_v11 = vmax.f32 %v1356_v1, 0.0  ;;  %v1236_v1 = vpop.permute.xlu0 %1235 }
 0x535   : > { %v1362_v10 = vadd.f32 %v1361_v9, %v1201_v3  ;;  %v1432_v13 = vmax.f32 %v1358_v4, 0.0 }
 0x536   : > { %v1433_v12 = vmax.f32 %v1360_v8, 0.0  ;;  %v1241_v8 = vpop.permute.xlu1 %1240 }
 0x537   : > { %v1434_v14 = vmax.f32 %v1362_v10, 0.0 }
 0x538   : > { %v1461_v15 = vpack.c.bf16 %v1433_v12, %v1431_v11 }
 0x539   : > { %v1462_v17 = vpack.c.bf16 %v1434_v14, %v1432_v13  ;;  %v1365_v18 = vpop.f32.mrb[40].mxu1 }
 0x53a   : > { %v1366_v19 = vadd.f32 %v1365_v18, %v1206_v16  ;;  %v1367_v20 = vpop.f32.mrb[41].mxu1 }
 0x53b   : > { %v1368_v22 = vadd.f32 %v1367_v20, %v1206_v16  ;;  %v1369_v23 = vpop.f32.mrb[42].mxu1  ;;  %1496 = vmatprep.subr.bf16.mxu0 %v1462_v17 }
 0x53c   : > { %v1370_v24 = vadd.f32 %v1369_v23, %v1211_v21  ;;  %v1371_v25 = vpop.f32.mrb[43].mxu1  ;;  %1497 = vmatpush1.bf16.msra.mxu0 %v1461_v15  ;;  %v1435_v27 = vmax.f32 %v1366_v19, 0.0  ;;  %v1246_v19 = vpop.permute.xlu0 %1245 }
 0x53d   : > { %v1372_v26 = vadd.f32 %v1371_v25, %v1211_v21  ;;  %v1436_v29 = vmax.f32 %v1368_v22, 0.0 }
 0x53e   : > { %v1437_v28 = vmax.f32 %v1370_v24, 0.0  ;;  %v1251_v24 = vpop.permute.xlu1 %1250 }
 0x53f   : > { %v1438_v30 = vmax.f32 %v1372_v26, 0.0 }
 0x540   : > { %v1463_v31 = vpack.c.bf16 %v1437_v28, %v1435_v27 }
 0x541   : > { %v1464_v33 = vpack.c.bf16 %v1438_v30, %v1436_v29  ;;  %v1375_v34 = vpop.f32.mrb[44].mxu1 }
 0x542   : > { %v1376_v35 = vadd.f32 %v1375_v34, %v1216_v32  ;;  %v1377_v36 = vpop.f32.mrb[45].mxu1 }
 0x543   : > { %v1378_v38 = vadd.f32 %v1377_v36, %v1216_v32  ;;  %v1379_v39 = vpop.f32.mrb[46].mxu1  ;;  %1498 = vmatprep.subr.bf16.mxu0 %v1464_v33 }
 0x544   : > { %v1380_v40 = vadd.f32 %v1379_v39, %v1221_v37  ;;  %v1381_v41 = vpop.f32.mrb[47].mxu1  ;;  %1499 = vmatpush1.bf16.msra.mxu0 %v1463_v31  ;;  %v1439_v43 = vmax.f32 %v1376_v35, 0.0  ;;  %v1256_v35 = vpop.permute.xlu0 %1255 }
 0x545   : > { %v1382_v42 = vadd.f32 %v1381_v41, %v1221_v37  ;;  %v1440_v45 = vmax.f32 %v1378_v38, 0.0 }
 0x546   : > { %v1441_v44 = vmax.f32 %v1380_v40, 0.0  ;;  %v1261_v40 = vpop.permute.xlu1 %1260 }
 0x547   : > { %v1442_v46 = vmax.f32 %v1382_v42, 0.0 }
 0x548   : > { %v1465_v47 = vpack.c.bf16 %v1441_v44, %v1439_v43 }
 0x549   : > { %v1466_v49 = vpack.c.bf16 %v1442_v46, %v1440_v45  ;;  %v1385_v50 = vpop.f32.mrb[48].mxu1 }
 0x54a   : > { %v1386_v51 = vadd.f32 %v1385_v50, %v1226_v48  ;;  %v1387_v52 = vpop.f32.mrb[49].mxu1 }
 0x54b   : > { %v1388_v54 = vadd.f32 %v1387_v52, %v1226_v48  ;;  %v1389_v55 = vpop.f32.mrb[50].mxu1  ;;  %1500 = vmatprep.subr.bf16.mxu0 %v1466_v49  ;;  %v3261_v52 = vld [vmem:[%s4084_s4 + $0x8] sm:$0xff]  }
 0x54c   : > { %v1390_v56 = vadd.f32 %v1389_v55, %v1231_v53  ;;  %v1391_v57 = vpop.f32.mrb[51].mxu1  ;;  %1501 = vmatpush1.bf16.msra.mxu0 %v1465_v47  ;;  %v1443_v59 = vmax.f32 %v1386_v51, 0.0  ;;  %v1486_v55 = vpop.permute.xlu0 %1485 }
 0x54d   : > { %v1392_v58 = vadd.f32 %v1391_v57, %v1231_v53  ;;  %v1444_v61 = vmax.f32 %v1388_v54, 0.0 }
 0x54e   : > { %v1445_v60 = vmax.f32 %v1390_v56, 0.0 }
 0x54f   : > { %v1446_v62 = vmax.f32 %v1392_v58, 0.0 }
 0x550   : > { %v1467_v63 = vpack.c.bf16 %v1445_v60, %v1443_v59 }
 0x551   : > { %v1468_v2 = vpack.c.bf16 %v1446_v62, %v1444_v61  ;;  %v1395_v3 = vpop.f32.mrb[52].mxu1 }
 0x552   : > { %v1396_v4 = vadd.f32 %v1395_v3, %v1236_v1  ;;  %v1397_v5 = vpop.f32.mrb[53].mxu1 }
 0x553   : > { %v1398_v9 = vadd.f32 %v1397_v5, %v1236_v1  ;;  %v1399_v10 = vpop.f32.mrb[54].mxu1  ;;  %1502 = vmatprep.subr.bf16.mxu0 %v1468_v2 }
 0x554   : > { %v1400_v11 = vadd.f32 %v1399_v10, %v1241_v8  ;;  %v1401_v12 = vpop.f32.mrb[55].mxu1  ;;  %1503 = vmatpush1.bf16.msra.mxu0 %v1467_v63  ;;  %v1447_v14 = vmax.f32 %v1396_v4, 0.0  ;;  %v1481_v63 = vpop.permute.xlu1 %1480 }
 0x555   : > { %v1402_v13 = vadd.f32 %v1401_v12, %v1241_v8  ;;  %v1448_v16 = vmax.f32 %v1398_v9, 0.0 }
 0x556   : > { %v1449_v15 = vmax.f32 %v1400_v11, 0.0 }
 0x557   : > { %v1450_v17 = vmax.f32 %v1402_v13, 0.0  ;;  %v3264_v13 = vld [vmem:[%s4081_s1 + $0x90] sm:$0xff]  }
 0x558   : > { %v1469_v18 = vpack.c.bf16 %v1449_v15, %v1447_v14  ;;  %v3265_v14 = vld [vmem:[%s4081_s1 + $0x98] sm:$0xff]   ;;  %v3266_v15 = vld [vmem:[%s4081_s1 + $0xa0] sm:$0xff]  }
 0x559   : > { %v1470_v20 = vpack.c.bf16 %v1450_v17, %v1448_v16  ;;  %v1405_v21 = vpop.f32.mrb[56].mxu1  ;;  %v3267_v16 = vld [vmem:[%s4081_s1 + $0xa8] sm:$0xff]   ;;  %v3268_v17 = vld [vmem:[%s4081_s1 + $0xb0] sm:$0xff]  }
 0x55a   : > { %v1406_v22 = vadd.f32 %v1405_v21, %v1246_v19  ;;  %v1407_v23 = vpop.f32.mrb[57].mxu1 }
 0x55b   : > { %v1408_v25 = vadd.f32 %v1407_v23, %v1246_v19  ;;  %v1409_v26 = vpop.f32.mrb[58].mxu1  ;;  %1504 = vmatprep.subr.bf16.mxu0 %v1470_v20 }
 0x55c   : > { %v1410_v27 = vadd.f32 %v1409_v26, %v1251_v24  ;;  %v1411_v28 = vpop.f32.mrb[59].mxu1  ;;  %1505 = vmatpush1.bf16.msra.mxu0 %v1469_v18  ;;  %v1451_v30 = vmax.f32 %v1406_v22, 0.0  ;;  %v3269_v18 = vld [vmem:[%s4081_s1 + $0xb8] sm:$0xff]  }
 0x55d   : > { %v1412_v29 = vadd.f32 %v1411_v28, %v1251_v24  ;;  %v1452_v32 = vmax.f32 %v1408_v25, 0.0 }
 0x55e   : > { %v1453_v31 = vmax.f32 %v1410_v27, 0.0 }
 0x55f   : > { %v1454_v33 = vmax.f32 %v1412_v29, 0.0 }
 0x560   : > { %v1471_v34 = vpack.c.bf16 %v1453_v31, %v1451_v30 }
 0x561   : > { %v1472_v36 = vpack.c.bf16 %v1454_v33, %v1452_v32  ;;  %v1415_v37 = vpop.f32.mrb[60].mxu1 }
 0x562   : > { %v1416_v38 = vadd.f32 %v1415_v37, %v1256_v35  ;;  %v1417_v39 = vpop.f32.mrb[61].mxu1 }
 0x563   : > { %v1418_v41 = vadd.f32 %v1417_v39, %v1256_v35  ;;  %v1419_v42 = vpop.f32.mrb[62].mxu1  ;;  %1506 = vmatprep.subr.bf16.mxu0 %v1472_v36 }
 0x564   : > { %v1420_v43 = vadd.f32 %v1419_v42, %v1261_v40  ;;  %v1421_v44 = vpop.f32.mrb[63].mxu1  ;;  %1507 = vmatpush1.bf16.msra.mxu0 %v1471_v34  ;;  %v1455_v46 = vmax.f32 %v1416_v38, 0.0 }
 0x565   : > { %v1422_v45 = vadd.f32 %v1421_v44, %v1261_v40  ;;  %v1456_v48 = vmax.f32 %v1418_v41, 0.0 }
 0x566   : > { %v1457_v47 = vmax.f32 %v1420_v43, 0.0 }
 0x567   : > { %v1458_v49 = vmax.f32 %v1422_v45, 0.0 }
 0x568   : > { %v1473_v50 = vpack.c.bf16 %v1457_v47, %v1455_v46 }
 0x569   : > { %v1474_v51 = vpack.c.bf16 %v1458_v49, %v1456_v48 }
 0x56b   : > { %1508 = vmatprep.subr.bf16.mxu0 %v1474_v51 }
 0x56c   : > { %1509 = vmatpush1.bf16.msra.mxu0 %v1473_v50 }
 0x56f   : > { %1527 = vmatmul.mubr.bf16.vlgmr.msra.gmra.mrb[68].mxu0 %v3261_v52 }
 0x570   : > { %1666 = vmatprep.mubr.bf16.mxu0 %v3378_v0 }
 0x642   : > { %v1528_v53 = vpop.f32.mrb[68].mxu0 }
 0x643   : > { %v1530_v54 = vpop.f32.mrb[69].mxu0  ;;  %v1529_v2 = vadd.f32 %v1528_v53, %v1481_v63 }
 0x644   : > { %v1532_v56 = vpop.f32.mrb[70].mxu0  ;;  %v1531_v4 = vadd.f32 %v1530_v54, %v1481_v63 }
 0x645   : > { %v1533_v57 = vadd.f32 %v1532_v56, %v1486_v55  ;;  %v1534_v58 = vpop.f32.mrb[71].mxu0 }
 0x646   : > { %v1535_v59 = vadd.f32 %v1534_v58, %v1486_v55 }
 0x647   : > { %v1537_v60 = vmul.f32 1.442695, %v1533_v57 }
 0x648   : > { %v1539_v61 = vmul.f32 1.442695, %v1535_v59 }
 0x649   : > { %3300 = vpow2.f32 %v1537_v60 }
 0x64a   : > { %3302 = vpow2.f32 %v1539_v61 }
 0x653   : > { %v3301_v62 = vpop.eup %3300 }
 0x654   : > { %v3303_v1 = vpop.eup %3302  ;;  %v1541_v3 = vmul.f32 %v3301_v62, %v3771_v6  ;;  %v3262_v6 = vld [vmem:[%s4081_s1 + $0x80] sm:$0xff]  }
 0x655   : > { %v1542_v5 = vmul.f32 %v3303_v1, %v3773_v7  ;;  %v3263_v7 = vld [vmem:[%s4081_s1 + $0x88] sm:$0xff]  }
 0x656   : > { %v3859_v8 = vadd.f32 %v1541_v3, %v1529_v2 }
 0x657   : > { %v3861_v9 = vadd.f32 %v1542_v5, %v1531_v4 }
 0x658   : > { %v1562_v10 = vpack.c.bf16 %v3859_v8, %v3859_v8 }
 0x659   : > { %v1563_v11 = vpack.c.bf16 %v3861_v9, %v3861_v9 }
 0x65a   : > { %v1629_v12 = vsel %vm339_vm0, %v1562_v10, 0 }
 0x65b   : > { %3048 = vmatprep.subr.msk.bf16.mxu0 %vm339_vm0, %v1563_v11 }
 0x65c   : > { %1635 = vmatpush1.bf16.msra.mxu0 %v1629_v12 }
 0x65f   : > { %3049 = vmatmul.mubr.msk.bf16.vlgmr.msra.gmra.mrb[72].mxu0 %vm314_vm1, %v3262_v6 }
 0x660   : > { %1676 = vmatprep.mubr.bf16.mxu0 %v3378_v0 }
 0x667   : > { %3050 = vmatmul.mubr.msk.bf16.gmra.mrb[76].mxu0 %vm314_vm1, %v3263_v7 }
 0x668   : > { %1686 = vmatprep.mubr.bf16.mxu0 %v3378_v0 }
 0x66f   : > { %3051 = vmatmul.mubr.msk.bf16.gmra.mrb[80].mxu0 %vm314_vm1, %v3264_v13 }
 0x670   : > { %1696 = vmatprep.mubr.bf16.mxu0 %v3378_v0 }
 0x677   : > { %3052 = vmatmul.mubr.msk.bf16.gmra.mrb[84].mxu0 %vm314_vm1, %v3265_v14 }
 0x678   : > { %1706 = vmatprep.mubr.bf16.mxu0 %v3378_v0 }
 0x67f   : > { %3053 = vmatmul.mubr.msk.bf16.gmra.mrb[88].mxu0 %vm314_vm1, %v3266_v15 }
 0x680   : > { %1716 = vmatprep.mubr.bf16.mxu0 %v3378_v0 }
 0x687   : > { %3054 = vmatmul.mubr.msk.bf16.gmra.mrb[92].mxu0 %vm314_vm1, %v3267_v16 }
 0x688   : > { %1726 = vmatprep.mubr.bf16.mxu0 %v3378_v0 }
 0x68f   : > { %3055 = vmatmul.mubr.msk.bf16.gmra.mrb[96].mxu0 %vm314_vm1, %v3268_v17 }
 0x690   : > { %1736 = vmatprep.mubr.bf16.mxu0 %v3378_v0 }
 0x697   : > { %3056 = vmatmul.mubr.msk.bf16.gmra.mrb[100].mxu0 %vm314_vm1, %v3269_v18 }
 0x698   : > { %2172 = vmatprep.mubr.bf16.mxu0 %v3378_v0 }
 0x732   : > { %v1668_v19 = vpop.f32.mrb[72].mxu0 }
 0x733   : > { %v1670_v20 = vpop.f32.mrb[73].mxu0  ;;  %v1764_v22 = vmax.f32 %v1668_v19, 0.0 }
 0x734   : > { %v1672_v21 = vpop.f32.mrb[74].mxu0  ;;  %v1765_v25 = vmax.f32 %v1670_v20, 0.0 }
 0x735   : > { %v1766_v23 = vmax.f32 %v1672_v21, 0.0  ;;  %v1674_v24 = vpop.f32.mrb[75].mxu0 }
 0x736   : > { %v1767_v26 = vmax.f32 %v1674_v24, 0.0 }
 0x737   : > { %v1796_v27 = vpack.c.bf16 %v1766_v23, %v1764_v22 }
 0x738   : > { %v1797_v28 = vpack.c.bf16 %v1767_v26, %v1765_v25 }
 0x73a   : > { %v1678_v29 = vpop.f32.mrb[76].mxu0  ;;  %1957 = vmatprep.subr.bf16.mxu1 %v1797_v28 }
 0x73b   : > { %v1680_v30 = vpop.f32.mrb[77].mxu0  ;;  %1958 = vmatpush1.bf16.msra.mxu1 %v1796_v27  ;;  %v1768_v32 = vmax.f32 %v1678_v29, 0.0 }
 0x73c   : > { %v1682_v31 = vpop.f32.mrb[78].mxu0  ;;  %v1769_v35 = vmax.f32 %v1680_v30, 0.0 }
 0x73d   : > { %v1770_v33 = vmax.f32 %v1682_v31, 0.0  ;;  %v1684_v34 = vpop.f32.mrb[79].mxu0 }
 0x73e   : > { %v1771_v36 = vmax.f32 %v1684_v34, 0.0 }
 0x73f   : > { %v1798_v37 = vpack.c.bf16 %v1770_v33, %v1768_v32 }
 0x740   : > { %v1799_v38 = vpack.c.bf16 %v1771_v36, %v1769_v35 }
 0x742   : > { %v1688_v39 = vpop.f32.mrb[80].mxu0  ;;  %1959 = vmatprep.subr.bf16.mxu1 %v1799_v38  ;;  %v3270_v38 = vld [vmem:[%s4082_s2 + $0x80] sm:$0xff]  }
 0x743   : > { %v1690_v40 = vpop.f32.mrb[81].mxu0  ;;  %1960 = vmatpush1.bf16.msra.mxu1 %v1798_v37  ;;  %v1772_v42 = vmax.f32 %v1688_v39, 0.0  ;;  %v3271_v39 = vld [vmem:[%s4082_s2 + $0x88] sm:$0xff]  }
 0x744   : > { %v1692_v41 = vpop.f32.mrb[82].mxu0  ;;  %v1773_v45 = vmax.f32 %v1690_v40, 0.0  ;;  %v3272_v40 = vld [vmem:[%s4082_s2 + $0x90] sm:$0xff]  }
 0x745   : > { %v1774_v43 = vmax.f32 %v1692_v41, 0.0  ;;  %v1694_v44 = vpop.f32.mrb[83].mxu0  ;;  %v3273_v41 = vld [vmem:[%s4082_s2 + $0x98] sm:$0xff]  }
 0x746   : > { %v1775_v46 = vmax.f32 %v1694_v44, 0.0  ;;  %v3276_v44 = vld [vmem:[%s4082_s2 + $0xb0] sm:$0xff]  }
 0x747   : > { %v1800_v47 = vpack.c.bf16 %v1774_v43, %v1772_v42  ;;  %v3274_v42 = vld [vmem:[%s4082_s2 + $0xa0] sm:$0xff]   ;;  %v3275_v43 = vld [vmem:[%s4082_s2 + $0xa8] sm:$0xff]  }
 0x748   : > { %v1801_v48 = vpack.c.bf16 %v1775_v46, %v1773_v45  ;;  %v3277_v45 = vld [vmem:[%s4082_s2 + $0xb8] sm:$0xff]   ;;  %v1832_v46 = vpop.permute.xlu0 %1831 }
 0x74a   : > { %v1698_v49 = vpop.f32.mrb[84].mxu0  ;;  %1961 = vmatprep.subr.bf16.mxu1 %v1801_v48 }
 0x74b   : > { %v1700_v50 = vpop.f32.mrb[85].mxu0  ;;  %1962 = vmatpush1.bf16.msra.mxu1 %v1800_v47  ;;  %v1776_v52 = vmax.f32 %v1698_v49, 0.0 }
 0x74c   : > { %v1702_v51 = vpop.f32.mrb[86].mxu0  ;;  %v1777_v55 = vmax.f32 %v1700_v50, 0.0  ;;  %v1837_v50 = vpop.permute.xlu1 %1836 }
 0x74d   : > { %v1778_v53 = vmax.f32 %v1702_v51, 0.0  ;;  %v1704_v54 = vpop.f32.mrb[87].mxu0 }
 0x74e   : > { %v1779_v56 = vmax.f32 %v1704_v54, 0.0 }
 0x74f   : > { %v1802_v57 = vpack.c.bf16 %v1778_v53, %v1776_v52 }
 0x750   : > { %v1803_v58 = vpack.c.bf16 %v1779_v56, %v1777_v55 }
 0x752   : > { %v1708_v59 = vpop.f32.mrb[88].mxu0  ;;  %1963 = vmatprep.subr.bf16.mxu1 %v1803_v58 }
 0x753   : > { %v1710_v60 = vpop.f32.mrb[89].mxu0  ;;  %1964 = vmatpush1.bf16.msra.mxu1 %v1802_v57  ;;  %v1780_v62 = vmax.f32 %v1708_v59, 0.0 }
 0x754   : > { %v1712_v61 = vpop.f32.mrb[90].mxu0  ;;  %v1781_v2 = vmax.f32 %v1710_v60, 0.0 }
 0x755   : > { %v1782_v63 = vmax.f32 %v1712_v61, 0.0  ;;  %v1714_v1 = vpop.f32.mrb[91].mxu0  ;;  %v1842_v61 = vpop.permute.xlu0 %1841 }
 0x756   : > { %v1783_v3 = vmax.f32 %v1714_v1, 0.0 }
 0x757   : > { %v1804_v4 = vpack.c.bf16 %v1782_v63, %v1780_v62 }
 0x758   : > { %v1805_v5 = vpack.c.bf16 %v1783_v3, %v1781_v2  ;;  %v1847_v3 = vpop.permute.xlu1 %1846 }
 0x75a   : > { %v1718_v10 = vpop.f32.mrb[92].mxu0  ;;  %1965 = vmatprep.subr.bf16.mxu1 %v1805_v5 }
 0x75b   : > { %v1720_v11 = vpop.f32.mrb[93].mxu0  ;;  %1966 = vmatpush1.bf16.msra.mxu1 %v1804_v4  ;;  %v1784_v6 = vmax.f32 %v1718_v10, 0.0 }
 0x75c   : > { %v1722_v12 = vpop.f32.mrb[94].mxu0  ;;  %v1785_v14 = vmax.f32 %v1720_v11, 0.0 }
 0x75d   : > { %v1786_v7 = vmax.f32 %v1722_v12, 0.0  ;;  %v1724_v13 = vpop.f32.mrb[95].mxu0 }
 0x75e   : > { %v1787_v15 = vmax.f32 %v1724_v13, 0.0 }
 0x75f   : > { %v1806_v16 = vpack.c.bf16 %v1786_v7, %v1784_v6 }
 0x760   : > { %v1807_v17 = vpack.c.bf16 %v1787_v15, %v1785_v14 }
 0x762   : > { %v1728_v18 = vpop.f32.mrb[96].mxu0  ;;  %1967 = vmatprep.subr.bf16.mxu1 %v1807_v17 }
 0x763   : > { %v1730_v19 = vpop.f32.mrb[97].mxu0  ;;  %1968 = vmatpush1.bf16.msra.mxu1 %v1806_v16  ;;  %v1788_v21 = vmax.f32 %v1728_v18, 0.0  ;;  %v1852_v16 = vpop.permute.xlu0 %1851 }
 0x764   : > { %v1732_v20 = vpop.f32.mrb[98].mxu0  ;;  %v1789_v24 = vmax.f32 %v1730_v19, 0.0 }
 0x765   : > { %v1790_v22 = vmax.f32 %v1732_v20, 0.0  ;;  %v1734_v23 = vpop.f32.mrb[99].mxu0 }
 0x766   : > { %v1791_v25 = vmax.f32 %v1734_v23, 0.0 }
 0x767   : > { %v1808_v26 = vpack.c.bf16 %v1790_v22, %v1788_v21  ;;  %v1857_v21 = vpop.permute.xlu1 %1856 }
 0x768   : > { %v1809_v27 = vpack.c.bf16 %v1791_v25, %v1789_v24 }
 0x76a   : > { %v1738_v28 = vpop.f32.mrb[100].mxu0  ;;  %1969 = vmatprep.subr.bf16.mxu1 %v1809_v27 }
 0x76b   : > { %v1740_v29 = vpop.f32.mrb[101].mxu0  ;;  %1970 = vmatpush1.bf16.msra.mxu1 %v1808_v26  ;;  %v1792_v31 = vmax.f32 %v1738_v28, 0.0 }
 0x76c   : > { %v1742_v30 = vpop.f32.mrb[102].mxu0  ;;  %v1793_v34 = vmax.f32 %v1740_v29, 0.0 }
 0x76d   : > { %v1794_v32 = vmax.f32 %v1742_v30, 0.0  ;;  %v1744_v33 = vpop.f32.mrb[103].mxu0 }
 0x76e   : > { %v1795_v35 = vmax.f32 %v1744_v33, 0.0 }
 0x76f   : > { %v1810_v36 = vpack.c.bf16 %v1794_v32, %v1792_v31  ;;  %v1862_v32 = vpop.permute.xlu0 %1861 }
 0x770   : > { %v1811_v37 = vpack.c.bf16 %v1795_v35, %v1793_v34 }
 0x772   : > { %1971 = vmatprep.subr.bf16.mxu1 %v1811_v37  ;;  %v1867_v37 = vpop.permute.xlu1 %1866 }
 0x773   : > { %1972 = vmatpush1.bf16.msra.mxu1 %v1810_v36 }
 0x776   : > { %1990 = vmatmul.mubr.bf16.vlgmr.msra.gmra.mrb[64].mxu1 %v3270_v38 }
 0x777   : > { %1999 = vmatprep.mubr.bf16.mxu1 %v3378_v0 }
 0x77e   : > { %2000 = vmatmul.mubr.bf16.gmra.mrb[68].mxu1 %v3271_v39 }
 0x77f   : > { %2009 = vmatprep.mubr.bf16.mxu1 %v3378_v0 }
 0x786   : > { %2010 = vmatmul.mubr.bf16.gmra.mrb[72].mxu1 %v3272_v40 }
 0x787   : > { %2019 = vmatprep.mubr.bf16.mxu1 %v3378_v0 }
 0x78e   : > { %2020 = vmatmul.mubr.bf16.gmra.mrb[76].mxu1 %v3273_v41 }
 0x78f   : > { %2029 = vmatprep.mubr.bf16.mxu1 %v3378_v0 }
 0x796   : > { %2030 = vmatmul.mubr.bf16.gmra.mrb[80].mxu1 %v3274_v42 }
 0x797   : > { %2039 = vmatprep.mubr.bf16.mxu1 %v3378_v0 }
 0x79e   : > { %2040 = vmatmul.mubr.bf16.gmra.mrb[84].mxu1 %v3275_v43 }
 0x79f   : > { %2049 = vmatprep.mubr.bf16.mxu1 %v3378_v0 }
 0x7a6   : > { %2050 = vmatmul.mubr.bf16.gmra.mrb[88].mxu1 %v3276_v44 }
 0x7a7   : > { %2059 = vmatprep.mubr.bf16.mxu1 %v3378_v0 }
 0x7ae   : > { %2060 = vmatmul.mubr.bf16.gmra.mrb[92].mxu1 %v3277_v45 }
 0x7af   : > { %2635 = vmatprep.mubr.bf16.mxu1 %v3378_v0 }
 0x849   : > { %v1991_v47 = vpop.f32.mrb[64].mxu1 }
 0x84a   : > { %v1992_v48 = vadd.f32 %v1991_v47, %v1832_v46  ;;  %v1993_v49 = vpop.f32.mrb[65].mxu1 }
 0x84b   : > { %v1994_v51 = vadd.f32 %v1993_v49, %v1832_v46  ;;  %v1995_v52 = vpop.f32.mrb[66].mxu1 }
 0x84c   : > { %v1996_v53 = vadd.f32 %v1995_v52, %v1837_v50  ;;  %v1997_v54 = vpop.f32.mrb[67].mxu1  ;;  %v2073_v56 = vmax.f32 %v1992_v48, 0.0  ;;  %v1872_v48 = vpop.permute.xlu0 %1871 }
 0x84d   : > { %v1998_v55 = vadd.f32 %v1997_v54, %v1837_v50  ;;  %v2074_v58 = vmax.f32 %v1994_v51, 0.0 }
 0x84e   : > { %v2075_v57 = vmax.f32 %v1996_v53, 0.0  ;;  %v1877_v53 = vpop.permute.xlu1 %1876 }
 0x84f   : > { %v2076_v59 = vmax.f32 %v1998_v55, 0.0 }
 0x850   : > { %v2105_v60 = vpack.c.bf16 %v2075_v57, %v2073_v56 }
 0x851   : > { %v2106_v62 = vpack.c.bf16 %v2076_v59, %v2074_v58  ;;  %v2001_v63 = vpop.f32.mrb[68].mxu1 }
 0x852   : > { %v2002_v1 = vadd.f32 %v2001_v63, %v1842_v61  ;;  %v2003_v2 = vpop.f32.mrb[69].mxu1 }
 0x853   : > { %v2004_v4 = vadd.f32 %v2003_v2, %v1842_v61  ;;  %v2005_v5 = vpop.f32.mrb[70].mxu1  ;;  %2140 = vmatprep.subr.bf16.mxu0 %v2106_v62 }
 0x854   : > { %v2006_v10 = vadd.f32 %v2005_v5, %v1847_v3  ;;  %v2007_v11 = vpop.f32.mrb[71].mxu1  ;;  %2141 = vmatpush1.bf16.msra.mxu0 %v2105_v60  ;;  %v2077_v6 = vmax.f32 %v2002_v1, 0.0  ;;  %v1882_v1 = vpop.permute.xlu0 %1881 }
 0x855   : > { %v2008_v12 = vadd.f32 %v2007_v11, %v1847_v3  ;;  %v2078_v13 = vmax.f32 %v2004_v4, 0.0 }
 0x856   : > { %v2079_v7 = vmax.f32 %v2006_v10, 0.0  ;;  %v1887_v10 = vpop.permute.xlu1 %1886 }
 0x857   : > { %v2080_v14 = vmax.f32 %v2008_v12, 0.0 }
 0x858   : > { %v2107_v15 = vpack.c.bf16 %v2079_v7, %v2077_v6 }
 0x859   : > { %v2108_v17 = vpack.c.bf16 %v2080_v14, %v2078_v13  ;;  %v2011_v18 = vpop.f32.mrb[72].mxu1 }
 0x85a   : > { %v2012_v19 = vadd.f32 %v2011_v18, %v1852_v16  ;;  %v2013_v20 = vpop.f32.mrb[73].mxu1 }
 0x85b   : > { %v2014_v22 = vadd.f32 %v2013_v20, %v1852_v16  ;;  %v2015_v23 = vpop.f32.mrb[74].mxu1  ;;  %2142 = vmatprep.subr.bf16.mxu0 %v2108_v17 }
 0x85c   : > { %v2016_v24 = vadd.f32 %v2015_v23, %v1857_v21  ;;  %v2017_v25 = vpop.f32.mrb[75].mxu1  ;;  %2143 = vmatpush1.bf16.msra.mxu0 %v2107_v15  ;;  %v2081_v27 = vmax.f32 %v2012_v19, 0.0  ;;  %v1892_v19 = vpop.permute.xlu0 %1891 }
 0x85d   : > { %v2018_v26 = vadd.f32 %v2017_v25, %v1857_v21  ;;  %v2082_v29 = vmax.f32 %v2014_v22, 0.0 }
 0x85e   : > { %v2083_v28 = vmax.f32 %v2016_v24, 0.0  ;;  %v1897_v24 = vpop.permute.xlu1 %1896 }
 0x85f   : > { %v2084_v30 = vmax.f32 %v2018_v26, 0.0 }
 0x860   : > { %v2109_v31 = vpack.c.bf16 %v2083_v28, %v2081_v27 }
 0x861   : > { %v2110_v33 = vpack.c.bf16 %v2084_v30, %v2082_v29  ;;  %v2021_v34 = vpop.f32.mrb[76].mxu1 }
 0x862   : > { %v2022_v35 = vadd.f32 %v2021_v34, %v1862_v32  ;;  %v2023_v36 = vpop.f32.mrb[77].mxu1 }
 0x863   : > { %v2024_v38 = vadd.f32 %v2023_v36, %v1862_v32  ;;  %v2025_v39 = vpop.f32.mrb[78].mxu1  ;;  %2144 = vmatprep.subr.bf16.mxu0 %v2110_v33 }
 0x864   : > { %v2026_v40 = vadd.f32 %v2025_v39, %v1867_v37  ;;  %v2027_v41 = vpop.f32.mrb[79].mxu1  ;;  %2145 = vmatpush1.bf16.msra.mxu0 %v2109_v31  ;;  %v2085_v43 = vmax.f32 %v2022_v35, 0.0  ;;  %v1902_v35 = vpop.permute.xlu0 %1901 }
 0x865   : > { %v2028_v42 = vadd.f32 %v2027_v41, %v1867_v37  ;;  %v2086_v45 = vmax.f32 %v2024_v38, 0.0 }
 0x866   : > { %v2087_v44 = vmax.f32 %v2026_v40, 0.0  ;;  %v1907_v40 = vpop.permute.xlu1 %1906 }
 0x867   : > { %v2088_v46 = vmax.f32 %v2028_v42, 0.0 }
 0x868   : > { %v2111_v47 = vpack.c.bf16 %v2087_v44, %v2085_v43 }
 0x869   : > { %v2112_v49 = vpack.c.bf16 %v2088_v46, %v2086_v45  ;;  %v2031_v50 = vpop.f32.mrb[80].mxu1 }
 0x86a   : > { %v2032_v51 = vadd.f32 %v2031_v50, %v1872_v48  ;;  %v2033_v52 = vpop.f32.mrb[81].mxu1 }
 0x86b   : > { %v2034_v54 = vadd.f32 %v2033_v52, %v1872_v48  ;;  %v2035_v55 = vpop.f32.mrb[82].mxu1  ;;  %2146 = vmatprep.subr.bf16.mxu0 %v2112_v49  ;;  %v3278_v52 = vld [vmem:[%s4084_s4 + $0x10] sm:$0xff]  }
 0x86c   : > { %v2036_v56 = vadd.f32 %v2035_v55, %v1877_v53  ;;  %v2037_v57 = vpop.f32.mrb[83].mxu1  ;;  %2147 = vmatpush1.bf16.msra.mxu0 %v2111_v47  ;;  %v2089_v59 = vmax.f32 %v2032_v51, 0.0  ;;  %v2132_v55 = vpop.permute.xlu0 %2131 }
 0x86d   : > { %v2038_v58 = vadd.f32 %v2037_v57, %v1877_v53  ;;  %v2090_v61 = vmax.f32 %v2034_v54, 0.0 }
 0x86e   : > { %v2091_v60 = vmax.f32 %v2036_v56, 0.0 }
 0x86f   : > { %v2092_v62 = vmax.f32 %v2038_v58, 0.0 }
 0x870   : > { %v2113_v63 = vpack.c.bf16 %v2091_v60, %v2089_v59 }
 0x871   : > { %v2114_v2 = vpack.c.bf16 %v2092_v62, %v2090_v61  ;;  %v2041_v3 = vpop.f32.mrb[84].mxu1 }
 0x872   : > { %v2042_v4 = vadd.f32 %v2041_v3, %v1882_v1  ;;  %v2043_v5 = vpop.f32.mrb[85].mxu1 }
 0x873   : > { %v2044_v11 = vadd.f32 %v2043_v5, %v1882_v1  ;;  %v2045_v12 = vpop.f32.mrb[86].mxu1  ;;  %2148 = vmatprep.subr.bf16.mxu0 %v2114_v2 }
 0x874   : > { %v2046_v6 = vadd.f32 %v2045_v12, %v1887_v10  ;;  %v2047_v7 = vpop.f32.mrb[87].mxu1  ;;  %2149 = vmatpush1.bf16.msra.mxu0 %v2113_v63  ;;  %v2093_v14 = vmax.f32 %v2042_v4, 0.0  ;;  %v2127_v63 = vpop.permute.xlu1 %2126 }
 0x875   : > { %v2048_v13 = vadd.f32 %v2047_v7, %v1887_v10  ;;  %v2094_v16 = vmax.f32 %v2044_v11, 0.0 }
 0x876   : > { %v2095_v15 = vmax.f32 %v2046_v6, 0.0 }
 0x877   : > { %v2096_v17 = vmax.f32 %v2048_v13, 0.0  ;;  %v3281_v13 = vld [vmem:[%s4081_s1 + $0xd0] sm:$0xff]  }
 0x878   : > { %v2115_v18 = vpack.c.bf16 %v2095_v15, %v2093_v14  ;;  %v3282_v14 = vld [vmem:[%s4081_s1 + $0xd8] sm:$0xff]   ;;  %v3283_v15 = vld [vmem:[%s4081_s1 + $0xe0] sm:$0xff]  }
 0x879   : > { %v2116_v20 = vpack.c.bf16 %v2096_v17, %v2094_v16  ;;  %v2051_v21 = vpop.f32.mrb[88].mxu1  ;;  %v3284_v16 = vld [vmem:[%s4081_s1 + $0xe8] sm:$0xff]   ;;  %v3285_v17 = vld [vmem:[%s4081_s1 + $0xf0] sm:$0xff]  }
 0x87a   : > { %v2052_v22 = vadd.f32 %v2051_v21, %v1892_v19  ;;  %v2053_v23 = vpop.f32.mrb[89].mxu1 }
 0x87b   : > { %v2054_v25 = vadd.f32 %v2053_v23, %v1892_v19  ;;  %v2055_v26 = vpop.f32.mrb[90].mxu1  ;;  %2150 = vmatprep.subr.bf16.mxu0 %v2116_v20 }
 0x87c   : > { %v2056_v27 = vadd.f32 %v2055_v26, %v1897_v24  ;;  %v2057_v28 = vpop.f32.mrb[91].mxu1  ;;  %2151 = vmatpush1.bf16.msra.mxu0 %v2115_v18  ;;  %v2097_v30 = vmax.f32 %v2052_v22, 0.0  ;;  %v3286_v18 = vld [vmem:[%s4081_s1 + $0xf8] sm:$0xff]  }
 0x87d   : > { %v2058_v29 = vadd.f32 %v2057_v28, %v1897_v24  ;;  %v2098_v32 = vmax.f32 %v2054_v25, 0.0 }
 0x87e   : > { %v2099_v31 = vmax.f32 %v2056_v27, 0.0 }
 0x87f   : > { %v2100_v33 = vmax.f32 %v2058_v29, 0.0 }
 0x880   : > { %v2117_v34 = vpack.c.bf16 %v2099_v31, %v2097_v30 }
 0x881   : > { %v2118_v36 = vpack.c.bf16 %v2100_v33, %v2098_v32  ;;  %v2061_v37 = vpop.f32.mrb[92].mxu1 }
 0x882   : > { %v2062_v38 = vadd.f32 %v2061_v37, %v1902_v35  ;;  %v2063_v39 = vpop.f32.mrb[93].mxu1 }
 0x883   : > { %v2064_v41 = vadd.f32 %v2063_v39, %v1902_v35  ;;  %v2065_v42 = vpop.f32.mrb[94].mxu1  ;;  %2152 = vmatprep.subr.bf16.mxu0 %v2118_v36 }
 0x884   : > { %v2066_v43 = vadd.f32 %v2065_v42, %v1907_v40  ;;  %v2067_v44 = vpop.f32.mrb[95].mxu1  ;;  %2153 = vmatpush1.bf16.msra.mxu0 %v2117_v34  ;;  %v2101_v46 = vmax.f32 %v2062_v38, 0.0 }
 0x885   : > { %v2068_v45 = vadd.f32 %v2067_v44, %v1907_v40  ;;  %v2102_v48 = vmax.f32 %v2064_v41, 0.0 }
 0x886   : > { %v2103_v47 = vmax.f32 %v2066_v43, 0.0 }
 0x887   : > { %v2104_v49 = vmax.f32 %v2068_v45, 0.0 }
 0x888   : > { %v2119_v50 = vpack.c.bf16 %v2103_v47, %v2101_v46 }
 0x889   : > { %v2120_v51 = vpack.c.bf16 %v2104_v49, %v2102_v48 }
 0x88b   : > { %2154 = vmatprep.subr.bf16.mxu0 %v2120_v51 }
 0x88c   : > { %2155 = vmatpush1.bf16.msra.mxu0 %v2119_v50 }
 0x88f   : > { %2173 = vmatmul.mubr.bf16.vlgmr.msra.gmra.mrb[104].mxu0 %v3278_v52 }
 0x890   : > { %2312 = vmatprep.mubr.bf16.mxu0 %v3378_v0 }
 0x962   : > { %v2174_v53 = vpop.f32.mrb[104].mxu0 }
 0x963   : > { %v2176_v54 = vpop.f32.mrb[105].mxu0  ;;  %v2175_v2 = vadd.f32 %v2174_v53, %v2127_v63 }
 0x964   : > { %v2178_v56 = vpop.f32.mrb[106].mxu0  ;;  %v2177_v4 = vadd.f32 %v2176_v54, %v2127_v63 }
 0x965   : > { %v2179_v57 = vadd.f32 %v2178_v56, %v2132_v55  ;;  %v2180_v58 = vpop.f32.mrb[107].mxu0 }
 0x966   : > { %v2181_v59 = vadd.f32 %v2180_v58, %v2132_v55 }
 0x967   : > { %v2183_v60 = vmul.f32 1.442695, %v2179_v57 }
 0x968   : > { %v2185_v61 = vmul.f32 1.442695, %v2181_v59 }
 0x969   : > { %3304 = vpow2.f32 %v2183_v60 }
 0x96a   : > { %3306 = vpow2.f32 %v2185_v61 }
 0x973   : > { %v3305_v62 = vpop.eup %3304 }
 0x974   : > { %v3307_v1 = vpop.eup %3306  ;;  %v2187_v3 = vmul.f32 %v3305_v62, %v3859_v8  ;;  %v3279_v8 = vld [vmem:[%s4081_s1 + $0xc0] sm:$0xff]  }
 0x975   : > { %v2188_v5 = vmul.f32 %v3307_v1, %v3861_v9  ;;  %v3280_v9 = vld [vmem:[%s4081_s1 + $0xc8] sm:$0xff]  }
 0x976   : > { %v3947_v10 = vadd.f32 %v2187_v3, %v2175_v2 }
 0x977   : > { %v3949_v11 = vadd.f32 %v2188_v5, %v2177_v4 }
 0x978   : > { %v2208_v12 = vpack.c.bf16 %v3947_v10, %v3947_v10 }
 0x979   : > { %v2209_v6 = vpack.c.bf16 %v3949_v11, %v3949_v11 }
 0x97a   : > { %v2275_v7 = vsel %vm339_vm0, %v2208_v12, 0 }
 0x97b   : > { %3126 = vmatprep.subr.msk.bf16.mxu0 %vm339_vm0, %v2209_v6 }
 0x97c   : > { %2281 = vmatpush1.bf16.msra.mxu0 %v2275_v7 }
 0x97f   : > { %3127 = vmatmul.mubr.msk.bf16.vlgmr.msra.gmra.mrb[108].mxu0 %vm314_vm1, %v3279_v8 }
 0x980   : > { %2322 = vmatprep.mubr.bf16.mxu0 %v3378_v0 }
 0x987   : > { %3128 = vmatmul.mubr.msk.bf16.gmra.mrb[112].mxu0 %vm314_vm1, %v3280_v9 }
 0x988   : > { %2332 = vmatprep.mubr.bf16.mxu0 %v3378_v0 }
 0x98f   : > { %3129 = vmatmul.mubr.msk.bf16.gmra.mrb[116].mxu0 %vm314_vm1, %v3281_v13 }
 0x990   : > { %2342 = vmatprep.mubr.bf16.mxu0 %v3378_v0 }
 0x997   : > { %3130 = vmatmul.mubr.msk.bf16.gmra.mrb[120].mxu0 %vm314_vm1, %v3282_v14 }
 0x998   : > { %2352 = vmatprep.mubr.bf16.mxu0 %v3378_v0 }
 0x99f   : > { %3131 = vmatmul.mubr.msk.bf16.gmra.mrb[124].mxu0 %vm314_vm1, %v3283_v15 }
 0x9a0   : > { %2362 = vmatprep.mubr.bf16.mxu0 %v3378_v0 }
 0x9a7   : > { %3132 = vmatmul.mubr.msk.bf16.gmra.mrb[128].mxu0 %vm314_vm1, %v3284_v16 }
 0x9a8   : > { %2372 = vmatprep.mubr.bf16.mxu0 %v3378_v0 }
 0x9af   : > { %3133 = vmatmul.mubr.msk.bf16.gmra.mrb[132].mxu0 %vm314_vm1, %v3285_v17 }
 0x9b0   : > { %2382 = vmatprep.mubr.bf16.mxu0 %v3378_v0 }
 0x9b7   : > { %3134 = vmatmul.mubr.msk.bf16.gmra.mrb[136].mxu0 %vm314_vm1, %v3286_v18 }
 0x9b8   : > { %2818 = vmatprep.mubr.bf16.mxu0 %v3378_v0 }
 0xa52   : > { %v2314_v19 = vpop.f32.mrb[108].mxu0 }
 0xa53   : > { %v2316_v20 = vpop.f32.mrb[109].mxu0  ;;  %v2410_v22 = vmax.f32 %v2314_v19, 0.0 }
 0xa54   : > { %v2318_v21 = vpop.f32.mrb[110].mxu0  ;;  %v2411_v25 = vmax.f32 %v2316_v20, 0.0 }
 0xa55   : > { %v2412_v23 = vmax.f32 %v2318_v21, 0.0  ;;  %v2320_v24 = vpop.f32.mrb[111].mxu0 }
 0xa56   : > { %v2413_v26 = vmax.f32 %v2320_v24, 0.0 }
 0xa57   : > { %v2442_v27 = vpack.c.bf16 %v2412_v23, %v2410_v22 }
 0xa58   : > { %v2443_v28 = vpack.c.bf16 %v2413_v26, %v2411_v25 }
 0xa5a   : > { %v2324_v29 = vpop.f32.mrb[112].mxu0  ;;  %2603 = vmatprep.subr.bf16.mxu1 %v2443_v28 }
 0xa5b   : > { %v2326_v30 = vpop.f32.mrb[113].mxu0  ;;  %2604 = vmatpush1.bf16.msra.mxu1 %v2442_v27  ;;  %v2414_v32 = vmax.f32 %v2324_v29, 0.0 }
 0xa5c   : > { %v2328_v31 = vpop.f32.mrb[114].mxu0  ;;  %v2415_v35 = vmax.f32 %v2326_v30, 0.0 }
 0xa5d   : > { %v2416_v33 = vmax.f32 %v2328_v31, 0.0  ;;  %v2330_v34 = vpop.f32.mrb[115].mxu0 }
 0xa5e   : > { %v2417_v36 = vmax.f32 %v2330_v34, 0.0 }
 0xa5f   : > { %v2444_v37 = vpack.c.bf16 %v2416_v33, %v2414_v32 }
 0xa60   : > { %v2445_v38 = vpack.c.bf16 %v2417_v36, %v2415_v35 }
 0xa62   : > { %v2334_v39 = vpop.f32.mrb[116].mxu0  ;;  %2605 = vmatprep.subr.bf16.mxu1 %v2445_v38  ;;  %v3287_v38 = vld [vmem:[%s4082_s2 + $0xc0] sm:$0xff]  }
 0xa63   : > { %v2336_v40 = vpop.f32.mrb[117].mxu0  ;;  %2606 = vmatpush1.bf16.msra.mxu1 %v2444_v37  ;;  %v2418_v42 = vmax.f32 %v2334_v39, 0.0  ;;  %v3288_v39 = vld [vmem:[%s4082_s2 + $0xc8] sm:$0xff]  }
 0xa64   : > { %v2338_v41 = vpop.f32.mrb[118].mxu0  ;;  %v2419_v45 = vmax.f32 %v2336_v40, 0.0  ;;  %v3289_v40 = vld [vmem:[%s4082_s2 + $0xd0] sm:$0xff]  }
 0xa65   : > { %v2420_v43 = vmax.f32 %v2338_v41, 0.0  ;;  %v2340_v44 = vpop.f32.mrb[119].mxu0  ;;  %v3290_v41 = vld [vmem:[%s4082_s2 + $0xd8] sm:$0xff]  }
 0xa66   : > { %v2421_v46 = vmax.f32 %v2340_v44, 0.0  ;;  %v3293_v44 = vld [vmem:[%s4082_s2 + $0xf0] sm:$0xff]  }
 0xa67   : > { %v2446_v47 = vpack.c.bf16 %v2420_v43, %v2418_v42  ;;  %v3291_v42 = vld [vmem:[%s4082_s2 + $0xe0] sm:$0xff]   ;;  %v3292_v43 = vld [vmem:[%s4082_s2 + $0xe8] sm:$0xff]  }
 0xa68   : > { %v2447_v48 = vpack.c.bf16 %v2421_v46, %v2419_v45  ;;  %v3294_v45 = vld [vmem:[%s4082_s2 + $0xf8] sm:$0xff]   ;;  %v2478_v46 = vpop.permute.xlu0 %2477 }
 0xa6a   : > { %v2344_v49 = vpop.f32.mrb[120].mxu0  ;;  %2607 = vmatprep.subr.bf16.mxu1 %v2447_v48 }
 0xa6b   : > { %v2346_v50 = vpop.f32.mrb[121].mxu0  ;;  %2608 = vmatpush1.bf16.msra.mxu1 %v2446_v47  ;;  %v2422_v52 = vmax.f32 %v2344_v49, 0.0 }
 0xa6c   : > { %v2348_v51 = vpop.f32.mrb[122].mxu0  ;;  %v2423_v55 = vmax.f32 %v2346_v50, 0.0  ;;  %v2483_v50 = vpop.permute.xlu1 %2482 }
 0xa6d   : > { %v2424_v53 = vmax.f32 %v2348_v51, 0.0  ;;  %v2350_v54 = vpop.f32.mrb[123].mxu0 }
 0xa6e   : > { %v2425_v56 = vmax.f32 %v2350_v54, 0.0 }
 0xa6f   : > { %v2448_v57 = vpack.c.bf16 %v2424_v53, %v2422_v52 }
 0xa70   : > { %v2449_v58 = vpack.c.bf16 %v2425_v56, %v2423_v55 }
 0xa72   : > { %v2354_v59 = vpop.f32.mrb[124].mxu0  ;;  %2609 = vmatprep.subr.bf16.mxu1 %v2449_v58 }
 0xa73   : > { %v2356_v60 = vpop.f32.mrb[125].mxu0  ;;  %2610 = vmatpush1.bf16.msra.mxu1 %v2448_v57  ;;  %v2426_v62 = vmax.f32 %v2354_v59, 0.0 }
 0xa74   : > { %v2358_v61 = vpop.f32.mrb[126].mxu0  ;;  %v2427_v2 = vmax.f32 %v2356_v60, 0.0  ;;  %v2488_v60 = vpop.permute.xlu0 %2487 }
 0xa75   : > { %v2428_v63 = vmax.f32 %v2358_v61, 0.0  ;;  %v2360_v1 = vpop.f32.mrb[127].mxu0 }
 0xa76   : > { %v2429_v3 = vmax.f32 %v2360_v1, 0.0 }
 0xa77   : > { %v2450_v4 = vpack.c.bf16 %v2428_v63, %v2426_v62 }
 0xa78   : > { %v2451_v5 = vpack.c.bf16 %v2429_v3, %v2427_v2  ;;  %v2493_v2 = vpop.permute.xlu1 %2492 }
 0xa7a   : > { %v2364_v12 = vpop.f32.mrb[128].mxu0  ;;  %2611 = vmatprep.subr.bf16.mxu1 %v2451_v5 }
 0xa7b   : > { %v2366_v6 = vpop.f32.mrb[129].mxu0  ;;  %2612 = vmatpush1.bf16.msra.mxu1 %v2450_v4  ;;  %v2430_v8 = vmax.f32 %v2364_v12, 0.0 }
 0xa7c   : > { %v2368_v7 = vpop.f32.mrb[130].mxu0  ;;  %v2431_v14 = vmax.f32 %v2366_v6, 0.0 }
 0xa7d   : > { %v2432_v9 = vmax.f32 %v2368_v7, 0.0  ;;  %v2370_v13 = vpop.f32.mrb[131].mxu0 }
 0xa7e   : > { %v2433_v15 = vmax.f32 %v2370_v13, 0.0 }
 0xa7f   : > { %v2452_v16 = vpack.c.bf16 %v2432_v9, %v2430_v8 }
 0xa80   : > { %v2453_v17 = vpack.c.bf16 %v2433_v15, %v2431_v14  ;;  %v2498_v15 = vpop.permute.xlu0 %2497 }
 0xa82   : > { %v2374_v18 = vpop.f32.mrb[132].mxu0  ;;  %2613 = vmatprep.subr.bf16.mxu1 %v2453_v17 }
 0xa83   : > { %v2376_v19 = vpop.f32.mrb[133].mxu0  ;;  %2614 = vmatpush1.bf16.msra.mxu1 %v2452_v16  ;;  %v2434_v21 = vmax.f32 %v2374_v18, 0.0 }
 0xa84   : > { %v2378_v20 = vpop.f32.mrb[134].mxu0  ;;  %v2435_v24 = vmax.f32 %v2376_v19, 0.0 }
 0xa85   : > { %v2436_v22 = vmax.f32 %v2378_v20, 0.0  ;;  %v2380_v23 = vpop.f32.mrb[135].mxu0  ;;  %v2503_v20 = vpop.permute.xlu1 %2502 }
 0xa86   : > { %v2437_v25 = vmax.f32 %v2380_v23, 0.0 }
 0xa87   : > { %v2454_v26 = vpack.c.bf16 %v2436_v22, %v2434_v21 }
 0xa88   : > { %v2455_v27 = vpack.c.bf16 %v2437_v25, %v2435_v24 }
 0xa8a   : > { %v2384_v28 = vpop.f32.mrb[136].mxu0  ;;  %2615 = vmatprep.subr.bf16.mxu1 %v2455_v27 }
 0xa8b   : > { %v2386_v29 = vpop.f32.mrb[137].mxu0  ;;  %2616 = vmatpush1.bf16.msra.mxu1 %v2454_v26  ;;  %v2438_v31 = vmax.f32 %v2384_v28, 0.0 }
 0xa8c   : > { %v2388_v30 = vpop.f32.mrb[138].mxu0  ;;  %v2439_v34 = vmax.f32 %v2386_v29, 0.0 }
 0xa8d   : > { %v2440_v32 = vmax.f32 %v2388_v30, 0.0  ;;  %v2390_v33 = vpop.f32.mrb[139].mxu0 }
 0xa8e   : > { %v2441_v35 = vmax.f32 %v2390_v33, 0.0 }
 0xa8f   : > { %v2456_v36 = vpack.c.bf16 %v2440_v32, %v2438_v31  ;;  %v2508_v31 = vpop.permute.xlu0 %2507 }
 0xa90   : > { %v2457_v37 = vpack.c.bf16 %v2441_v35, %v2439_v34 }
 0xa92   : > { %2617 = vmatprep.subr.bf16.mxu1 %v2457_v37 }
 0xa93   : > { %2618 = vmatpush1.bf16.msra.mxu1 %v2456_v36  ;;  %v2513_v36 = vpop.permute.xlu1 %2512 }
 0xa96   : > { %2636 = vmatmul.mubr.bf16.vlgmr.msra.gmra.mrb[96].mxu1 %v3287_v38 }
 0xa97   : > { %2645 = vmatprep.mubr.bf16.mxu1 %v3378_v0 }
 0xa9e   : > { %2646 = vmatmul.mubr.bf16.gmra.mrb[100].mxu1 %v3288_v39 }
 0xa9f   : > { %2655 = vmatprep.mubr.bf16.mxu1 %v3378_v0 }
 0xaa6   : > { %2656 = vmatmul.mubr.bf16.gmra.mrb[104].mxu1 %v3289_v40 }
 0xaa7   : > { %2665 = vmatprep.mubr.bf16.mxu1 %v3378_v0 }
 0xaae   : > { %2666 = vmatmul.mubr.bf16.gmra.mrb[108].mxu1 %v3290_v41 }
 0xaaf   : > { %2675 = vmatprep.mubr.bf16.mxu1 %v3378_v0 }
 0xab6   : > { %2676 = vmatmul.mubr.bf16.gmra.mrb[112].mxu1 %v3291_v42 }
 0xab7   : > { %2685 = vmatprep.mubr.bf16.mxu1 %v3378_v0 }
 0xabe   : > { %2686 = vmatmul.mubr.bf16.gmra.mrb[116].mxu1 %v3292_v43 }
 0xabf   : > { %2695 = vmatprep.mubr.bf16.mxu1 %v3378_v0 }
 0xac6   : > { %2696 = vmatmul.mubr.bf16.gmra.mrb[120].mxu1 %v3293_v44 }
 0xac7   : > { %2705 = vmatprep.mubr.bf16.mxu1 %v3378_v0 }
 0xace   : > { %2706 = vmatmul.mubr.bf16.gmra.mrb[124].mxu1 %v3294_v45 }
 0xb69   : > { %v2637_v47 = vpop.f32.mrb[96].mxu1 }
 0xb6a   : > { %v2638_v48 = vadd.f32 %v2637_v47, %v2478_v46  ;;  %v2639_v49 = vpop.f32.mrb[97].mxu1  ;;  %v2518_v47 = vpop.permute.xlu0 %2517 }
 0xb6b   : > { %v2640_v51 = vadd.f32 %v2639_v49, %v2478_v46  ;;  %v2641_v52 = vpop.f32.mrb[98].mxu1 }
 0xb6c   : > { %v2642_v53 = vadd.f32 %v2641_v52, %v2483_v50  ;;  %v2643_v54 = vpop.f32.mrb[99].mxu1  ;;  %v2719_v56 = vmax.f32 %v2638_v48, 0.0  ;;  %v2523_v52 = vpop.permute.xlu1 %2522 }
 0xb6d   : > { %v2644_v55 = vadd.f32 %v2643_v54, %v2483_v50  ;;  %v2720_v58 = vmax.f32 %v2640_v51, 0.0 }
 0xb6e   : > { %v2721_v57 = vmax.f32 %v2642_v53, 0.0 }
 0xb6f   : > { %v2722_v59 = vmax.f32 %v2644_v55, 0.0 }
 0xb70   : > { %v2751_v0 = vpack.c.bf16 %v2721_v57, %v2719_v56 }
 0xb71   : > { %v2752_v61 = vpack.c.bf16 %v2722_v59, %v2720_v58  ;;  %v2647_v62 = vpop.f32.mrb[100].mxu1 }
 0xb72   : > { %v2648_v63 = vadd.f32 %v2647_v62, %v2488_v60  ;;  %v2649_v1 = vpop.f32.mrb[101].mxu1  ;;  %v2528_v62 = vpop.permute.xlu0 %2527 }
 0xb73   : > { %v2650_v3 = vadd.f32 %v2649_v1, %v2488_v60  ;;  %v2651_v4 = vpop.f32.mrb[102].mxu1  ;;  %2786 = vmatprep.subr.bf16.mxu0 %v2752_v61 }
 0xb74   : > { %v2652_v5 = vadd.f32 %v2651_v4, %v2493_v2  ;;  %v2653_v12 = vpop.f32.mrb[103].mxu1  ;;  %2787 = vmatpush1.bf16.msra.mxu0 %v2751_v0  ;;  %v2723_v7 = vmax.f32 %v2648_v63, 0.0  ;;  %v2533_v4 = vpop.permute.xlu1 %2532 }
 0xb75   : > { %v2654_v6 = vadd.f32 %v2653_v12, %v2493_v2  ;;  %v2724_v9 = vmax.f32 %v2650_v3, 0.0 }
 0xb76   : > { %v2725_v8 = vmax.f32 %v2652_v5, 0.0 }
 0xb77   : > { %v2726_v13 = vmax.f32 %v2654_v6, 0.0 }
 0xb78   : > { %v2753_v14 = vpack.c.bf16 %v2725_v8, %v2723_v7 }
 0xb79   : > { %v2754_v16 = vpack.c.bf16 %v2726_v13, %v2724_v9  ;;  %v2657_v17 = vpop.f32.mrb[104].mxu1 }
 0xb7a   : > { %v2658_v18 = vadd.f32 %v2657_v17, %v2498_v15  ;;  %v2659_v19 = vpop.f32.mrb[105].mxu1  ;;  %v2538_v17 = vpop.permute.xlu0 %2537 }
 0xb7b   : > { %v2660_v21 = vadd.f32 %v2659_v19, %v2498_v15  ;;  %v2661_v22 = vpop.f32.mrb[106].mxu1  ;;  %2788 = vmatprep.subr.bf16.mxu0 %v2754_v16 }
 0xb7c   : > { %v2662_v23 = vadd.f32 %v2661_v22, %v2503_v20  ;;  %v2663_v24 = vpop.f32.mrb[107].mxu1  ;;  %2789 = vmatpush1.bf16.msra.mxu0 %v2753_v14  ;;  %v2727_v26 = vmax.f32 %v2658_v18, 0.0  ;;  %v2543_v22 = vpop.permute.xlu1 %2542 }
 0xb7d   : > { %v2664_v25 = vadd.f32 %v2663_v24, %v2503_v20  ;;  %v2728_v28 = vmax.f32 %v2660_v21, 0.0 }
 0xb7e   : > { %v2729_v27 = vmax.f32 %v2662_v23, 0.0 }
 0xb7f   : > { %v2730_v29 = vmax.f32 %v2664_v25, 0.0 }
 0xb80   : > { %v2755_v30 = vpack.c.bf16 %v2729_v27, %v2727_v26 }
 0xb81   : > { %v2756_v32 = vpack.c.bf16 %v2730_v29, %v2728_v28  ;;  %v2667_v33 = vpop.f32.mrb[108].mxu1 }
 0xb82   : > { %v2668_v34 = vadd.f32 %v2667_v33, %v2508_v31  ;;  %v2669_v35 = vpop.f32.mrb[109].mxu1  ;;  %v2548_v33 = vpop.permute.xlu0 %2547 }
 0xb83   : > { %v2670_v37 = vadd.f32 %v2669_v35, %v2508_v31  ;;  %v2671_v38 = vpop.f32.mrb[110].mxu1  ;;  %2790 = vmatprep.subr.bf16.mxu0 %v2756_v32 }
 0xb84   : > { %v2672_v39 = vadd.f32 %v2671_v38, %v2513_v36  ;;  %v2673_v40 = vpop.f32.mrb[111].mxu1  ;;  %2791 = vmatpush1.bf16.msra.mxu0 %v2755_v30  ;;  %v2731_v42 = vmax.f32 %v2668_v34, 0.0  ;;  %v2553_v38 = vpop.permute.xlu1 %2552 }
 0xb85   : > { %v2674_v41 = vadd.f32 %v2673_v40, %v2513_v36  ;;  %v2732_v44 = vmax.f32 %v2670_v37, 0.0 }
 0xb86   : > { %v2733_v43 = vmax.f32 %v2672_v39, 0.0 }
 0xb87   : > { %v2734_v45 = vmax.f32 %v2674_v41, 0.0 }
 0xb88   : > { %v2757_v46 = vpack.c.bf16 %v2733_v43, %v2731_v42 }
 0xb89   : > { %v2758_v48 = vpack.c.bf16 %v2734_v45, %v2732_v44  ;;  %v2677_v49 = vpop.f32.mrb[112].mxu1 }
 0xb8a   : > { %v2678_v50 = vadd.f32 %v2677_v49, %v2518_v47  ;;  %v2679_v51 = vpop.f32.mrb[113].mxu1 }
 0xb8b   : > { %v2680_v53 = vadd.f32 %v2679_v51, %v2518_v47  ;;  %v2681_v54 = vpop.f32.mrb[114].mxu1  ;;  %2792 = vmatprep.subr.bf16.mxu0 %v2758_v48 }
 0xb8c   : > { %v2682_v55 = vadd.f32 %v2681_v54, %v2523_v52  ;;  %v2683_v56 = vpop.f32.mrb[115].mxu1  ;;  %2793 = vmatpush1.bf16.msra.mxu0 %v2757_v46  ;;  %v2735_v58 = vmax.f32 %v2678_v50, 0.0  ;;  %v3295_v50 = vld [vmem:[%s4084_s4 + $0x18] sm:$0xff]  }
 0xb8d   : > { %v2684_v57 = vadd.f32 %v2683_v56, %v2523_v52  ;;  %v2736_v0 = vmax.f32 %v2680_v53, 0.0  ;;  %v2778_v53 = vpop.permute.xlu0 %2777 }
 0xb8e   : > { %v2737_v59 = vmax.f32 %v2682_v55, 0.0 }
 0xb8f   : > { %v2738_v60 = vmax.f32 %v2684_v57, 0.0 }
 0xb90   : > { %v2759_v61 = vpack.c.bf16 %v2737_v59, %v2735_v58 }
 0xb91   : > { %v2760_v63 = vpack.c.bf16 %v2738_v60, %v2736_v0  ;;  %v2687_v1 = vpop.f32.mrb[116].mxu1  ;;  %v2773_v60 = vpop.permute.xlu1 %2772 }
 0xb92   : > { %v2688_v2 = vadd.f32 %v2687_v1, %v2528_v62  ;;  %v2689_v3 = vpop.f32.mrb[117].mxu1 }
 0xb93   : > { %v2690_v5 = vadd.f32 %v2689_v3, %v2528_v62  ;;  %v2691_v12 = vpop.f32.mrb[118].mxu1  ;;  %2794 = vmatprep.subr.bf16.mxu0 %v2760_v63 }
 0xb94   : > { %v2692_v6 = vadd.f32 %v2691_v12, %v2533_v4  ;;  %v2693_v7 = vpop.f32.mrb[119].mxu1  ;;  %2795 = vmatpush1.bf16.msra.mxu0 %v2759_v61  ;;  %v2739_v9 = vmax.f32 %v2688_v2, 0.0 }
 0xb95   : > { %v2694_v8 = vadd.f32 %v2693_v7, %v2533_v4  ;;  %v2740_v14 = vmax.f32 %v2690_v5, 0.0 }
 0xb96   : > { %v2741_v13 = vmax.f32 %v2692_v6, 0.0 }
 0xb97   : > { %v2742_v15 = vmax.f32 %v2694_v8, 0.0 }
 0xb98   : > { %v2761_v16 = vpack.c.bf16 %v2741_v13, %v2739_v9 }
 0xb99   : > { %v2762_v18 = vpack.c.bf16 %v2742_v15, %v2740_v14  ;;  %v2697_v19 = vpop.f32.mrb[120].mxu1 }
 0xb9a   : > { %v2698_v20 = vadd.f32 %v2697_v19, %v2538_v17  ;;  %v2699_v21 = vpop.f32.mrb[121].mxu1 }
 0xb9b   : > { %v2700_v23 = vadd.f32 %v2699_v21, %v2538_v17  ;;  %v2701_v24 = vpop.f32.mrb[122].mxu1  ;;  %2796 = vmatprep.subr.bf16.mxu0 %v2762_v18 }
 0xb9c   : > { %v2702_v25 = vadd.f32 %v2701_v24, %v2543_v22  ;;  %v2703_v26 = vpop.f32.mrb[123].mxu1  ;;  %2797 = vmatpush1.bf16.msra.mxu0 %v2761_v16  ;;  %v2743_v28 = vmax.f32 %v2698_v20, 0.0 }
 0xb9d   : > { %v2704_v27 = vadd.f32 %v2703_v26, %v2543_v22  ;;  %v2744_v30 = vmax.f32 %v2700_v23, 0.0 }
 0xb9e   : > { %v2745_v29 = vmax.f32 %v2702_v25, 0.0 }
 0xb9f   : > { %v2746_v31 = vmax.f32 %v2704_v27, 0.0 }
 0xba0   : > { %v2763_v32 = vpack.c.bf16 %v2745_v29, %v2743_v28 }
 0xba1   : > { %v2764_v34 = vpack.c.bf16 %v2746_v31, %v2744_v30  ;;  %v2707_v35 = vpop.f32.mrb[124].mxu1 }
 0xba2   : > { %v2708_v36 = vadd.f32 %v2707_v35, %v2548_v33  ;;  %v2709_v37 = vpop.f32.mrb[125].mxu1 }
 0xba3   : > { %v2710_v39 = vadd.f32 %v2709_v37, %v2548_v33  ;;  %v2711_v40 = vpop.f32.mrb[126].mxu1  ;;  %2798 = vmatprep.subr.bf16.mxu0 %v2764_v34 }
 0xba4   : > { %v2712_v41 = vadd.f32 %v2711_v40, %v2553_v38  ;;  %v2713_v42 = vpop.f32.mrb[127].mxu1  ;;  %2799 = vmatpush1.bf16.msra.mxu0 %v2763_v32  ;;  %v2747_v44 = vmax.f32 %v2708_v36, 0.0 }
 0xba5   : > { %v2714_v43 = vadd.f32 %v2713_v42, %v2553_v38  ;;  %v2748_v46 = vmax.f32 %v2710_v39, 0.0 }
 0xba6   : > { %v2749_v45 = vmax.f32 %v2712_v41, 0.0 }
 0xba7   : > { %v2750_v47 = vmax.f32 %v2714_v43, 0.0 }
 0xba8   : > { %v2765_v48 = vpack.c.bf16 %v2749_v45, %v2747_v44 }
 0xba9   : > { %v2766_v49 = vpack.c.bf16 %v2750_v47, %v2748_v46 }
 0xbab   : > { %2800 = vmatprep.subr.bf16.mxu0 %v2766_v49 }
 0xbac   : > { %2801 = vmatpush1.bf16.msra.mxu0 %v2765_v48 }
 0xbaf   : > { %2819 = vmatmul.mubr.bf16.vlgmr.msra.gmra.mrb[140].mxu0 %v3295_v50 }
 0xc82   : > { %v2820_v51 = vpop.f32.mrb[140].mxu0 }
 0xc83   : > { %v2822_v52 = vpop.f32.mrb[141].mxu0  ;;  %v2821_v62 = vadd.f32 %v2820_v51, %v2773_v60 }
 0xc84   : > { %v2824_v54 = vpop.f32.mrb[142].mxu0  ;;  %v2823_v1 = vadd.f32 %v2822_v52, %v2773_v60 }
 0xc85   : > { %v2825_v55 = vadd.f32 %v2824_v54, %v2778_v53  ;;  %v2826_v56 = vpop.f32.mrb[143].mxu0 }
 0xc86   : > { %v2827_v57 = vadd.f32 %v2826_v56, %v2778_v53 }
 0xc87   : > { %v2829_v58 = vmul.f32 1.442695, %v2825_v55 }
 0xc88   : > { %v2831_v59 = vmul.f32 1.442695, %v2827_v57 }
 0xc89   : > { %3308 = vpow2.f32 %v2829_v58 }
 0xc8a   : > { %3310 = vpow2.f32 %v2831_v59 }
 0xc93   : > { %v3309_v0 = vpop.eup %3308 }
 0xc94   : > { %v3311_v61 = vpop.eup %3310  ;;  %v2833_v63 = vmul.f32 %v3309_v0, %v3947_v10 }
 0xc95   : > { %v2834_v2 = vmul.f32 %v3311_v61, %v3949_v11 }
 0xc96   : > { %v2835_v3 = vadd.f32 %v2833_v63, %v2821_v62 }
 0xc97   : > { %v2836_v4 = vadd.f32 %v2834_v2, %v2823_v1 }
 0xc98   : > { %2837 = vst [vmem:[%s245_s9] sm:$0xff] %v2835_v3 }
 0xc99   : > { %2838 = vst [vmem:[%s245_s9 + $0x8] sm:$0xff] %v2836_v4 }
 0xc9a   : > { %3327 = shalt.err (!%p3324_p3)
}
 0xc9b   : > { %s3328_s18 = scalar_lea.hbm %s4038_s12, 256  ;;  %s3332_s26 = scalar_lea.hbm %s4086_s6, 512 }
 0xc9c   : > { %p3329_p4 = scmp.ne.s32.totalorder %s4038_s12, %s3328_s18  ;;  %p3333_p9 = scmp.lt.u32.totalorder %s4038_s12, %s4086_s6 }
 0xc9d   : > { %p3334_p10 = scmp.lt.u32.totalorder %s3332_s26, %s3328_s18  ;;  %p3336_p12 = scmp.lt.u32.totalorder %s3328_s18, %s4038_s12 }
 0xc9e   : > { %p3330_p7 = pnand %p3329_p4, %p3453_p5 }
 0xc9f   : > { %p3335_p11 = por %p3334_p10, %p3333_p9 }
 0xca0   : > { %p3331_p8 = pneg %p3330_p7 }
 0xca1   : > { %p3337_p13 = por %p3336_p12, %p3335_p11 }
 0xca3   : > { %p3338_p0 = pnand %p3337_p13, %p3331_p8 }
 0xca5   : > { %3341 = shalt.err (!%p3338_p0)
}
 0xca6   : > { %3186 = dma.vmem_to_hbm [thread:$0]  (%p3453_p5), %s4040_s10, 256, %s4038_s12, %s2840_s25  }
 0xca7 PF: > { %p3192_p1 = scmp.ge.s32.totalorder %s3376_s24, 2  ;;  %s2866_s9 = sand.u32 1, %s3364_s21  }
 0xca8   : > { %s2867_s13 = scalar_lea.sflag [#allocation3], %s2866_s9 }
 0xca9   : > { %p3189_p2 = pnand %p3192_p1, %p3457_p6 }
 0xcab   : > { %3359 = dma.done.wait (!%p3189_p2), %s2867_s13, 256  }
 0xcac   : > { %3361 = vsyncadd (!%p3189_p2), %s2867_s13, 4294967040  ;;  %p16_p3 = scmp.ge.s32.totalorder %s3440_s27, 4   ;;  %s4089_s21 = smov %s3368_s22 }
 0xcad   : > { %s4090_s22 = smov %s3372_s23  ;;  %s4091_s23 = smov %s3451_s30 }
 0xcae   : > { %s4092_s24 = smov %s3440_s27  ;;  %18 = sbr.rel (!%p16_p3) target bundleno = 3 (0x3), region = 94 }
 0xcb5   :  { %2872 = vsyncpa [#allocation3], 1 }
 0xcb6   :  { %2874 = vsyncpa [#allocation3 + $0x1], 1 }

</bundles_post_ra>
